<compile_context>
chip_gen: v7x
topology: tpu7x:2x2x1
jax: 0.10.0
libtpu: 0.0.40
codegen_flags: <defaults>
</compile_context>

<pallas_src>
import jax
import jax.numpy as jnp
from jax.experimental import pallas as pl
from jax.experimental.pallas import tpu as pltpu


def make_double_conv_bn_kernel(H, W, K, Cin, Cout, center, bs):
    p = K // 2
    HW = H * W
    offs = tuple(range(-p, p + 1))

    def kernel(x_ref, w1_ref, w2_ref, w3_ref, pp_ref, out_ref, xs_ref):
        f32 = jnp.float32

        # Column-boundary masks: shifting the flattened H*W lane axis by +-1
        # wraps across image rows; mask those output columns to zero.
        lane = jax.lax.broadcasted_iota(jnp.int32, (1, HW), 1)
        col = (lane & (W - 1)) if (W & (W - 1)) == 0 else (lane % W)
        wmask = {ow: (col >= -ow) if ow < 0 else (col < W - ow)
                 for ow in offs if ow != 0}

        # Zero only the halo of the stage-3 scratch (interior is fully
        # overwritten per image).  Done per grid step so it stays correct when
        # the batch axis is split across megacore TensorCores.
        xs_ref[:, 0:center] = jnp.zeros((Cout, center), f32)
        xs_ref[:, center + HW:center + HW + center] = jnp.zeros((Cout, center), f32)

        # Packed per-channel params: columns [b1,s1,t1, b2,s2,t2, b3,s3,t3].
        b1 = pp_ref[:, 0:1]; s1 = pp_ref[:, 1:2]; t1 = pp_ref[:, 2:3]
        b2 = pp_ref[:, 3:4]; s2 = pp_ref[:, 4:5]; t2 = pp_ref[:, 5:6]
        b3 = pp_ref[:, 6:7]; s3 = pp_ref[:, 7:8]; t3 = pp_ref[:, 8:9]

        def conv_same(read, w_ref):
            """sum over taps of W_tap (Cout,Cin) @ lane-shifted input (Cin,HW)."""
            acc = None
            for ow in offs:
                part = None
                for oh in offs:
                    tap = (oh + p) * K + (ow + p)
                    d = jnp.dot(w_ref[tap], read(oh * W + ow),
                                preferred_element_type=f32)
                    part = d if part is None else part + d
                if ow != 0:
                    part = jnp.where(wmask[ow], part, 0.0)
                acc = part if acc is None else acc + part
            return acc

        for b in range(bs):
            # ---- stage 1: conv1 (KxK 'same') -> relu -> bn1 -----------------
            read1 = lambda s, b=b: x_ref[b, :, center + s:center + s + HW]
            a1 = conv_same(read1, w1_ref) + b1
            x1 = jnp.maximum(a1, 0.0) * s1 + t1                  # (Cout, HW)

            # ---- stage 2: conv2 (1x1) -> relu -> bn2, += x1 -----------------
            a2 = jnp.dot(w2_ref[...], x1, preferred_element_type=f32) + b2
            x2 = jnp.maximum(a2, 0.0) * s2 + t2 + x1

            # ---- stage 3: conv3 (KxK 'same') -> relu -> bn3, += x1 + x2 -----
            xs_ref[:, center:center + HW] = x2                   # aligned store
            read3 = lambda s: xs_ref[:, center + s:center + s + HW]
            a3 = conv_same(read3, w3_ref) + b3
            x3 = jnp.maximum(a3, 0.0) * s3 + t3

            out_ref[b] = (x3 + x1 + x2).astype(out_ref.dtype)    # lane-dense

    return kernel


def double_conv_bn(x_nchw, params, kernel_size=3, eps=1e-5, images_per_step=8):
    """Pallas implementation of DoubleConvBN.forward (eval mode)."""
    N, Cin, H, W = x_nchw.shape
    K = kernel_size
    p = K // 2
    Cout = params["w1"].shape[0]
    HW = H * W
    center = 128                       # lane-aligned zero halo on each side
    assert center >= p * W + p, "spatial halo too small for this kernel size"
    L = 2 * center + HW

    # Images per grid step: largest divisor of N not exceeding the cap.
    bs = 1
    for d in range(1, min(N, images_per_step) + 1):
        if N % d == 0:
            bs = d
    grid = (N // bs,)

    f32 = jnp.float32
    # NCHW is already channels-first: flatten spatial onto the lane dim and pad.
    x_flat = x_nchw.reshape(N, Cin, HW).astype(f32)
    x_pad = jnp.pad(x_flat, ((0, 0), (0, 0), (center, center)))

    # Conv weights -> per-tap (Cout, Cin) with taps on the leading axis.
    w1 = jnp.transpose(params["w1"], (2, 3, 0, 1)).reshape(K * K, Cout, Cin).astype(f32)
    w3 = jnp.transpose(params["w3"], (2, 3, 0, 1)).reshape(K * K, Cout, Cout).astype(f32)
    w2 = params["w2"][:, :, 0, 0].astype(f32)                      # (Cout, Cout)

    # Fold eval-mode BN into per-channel scale/shift; pack with conv biases.
    def fold_bn(g, be, m, v):
        s = g / jnp.sqrt(v + eps)
        return s, be - m * s

    s1, t1 = fold_bn(params["g1"], params["be1"], params["m1"], params["v1"])
    s2, t2 = fold_bn(params["g2"], params["be2"], params["m2"], params["v2"])
    s3, t3 = fold_bn(params["g3"], params["be3"], params["m3"], params["v3"])
    pp = jnp.stack([params["b1"], s1, t1,
                    params["b2"], s2, t2,
                    params["b3"], s3, t3], axis=1).astype(f32)     # (Cout, 9)

    grid_spec = pltpu.PrefetchScalarGridSpec(
        num_scalar_prefetch=0,
        grid=grid,
        in_specs=[
            pl.BlockSpec((bs, Cin, L), lambda n: (n, 0, 0)),           # x (padded)
            pl.BlockSpec((K * K, Cout, Cin), lambda n: (0, 0, 0)),     # w1 taps
            pl.BlockSpec((Cout, Cout), lambda n: (0, 0)),              # w2 (1x1)
            pl.BlockSpec((K * K, Cout, Cout), lambda n: (0, 0, 0)),    # w3 taps
            pl.BlockSpec((Cout, 9), lambda n: (0, 0)),                 # packed b/s/t
        ],
        out_specs=pl.BlockSpec((bs, Cout, HW), lambda n: (n, 0, 0)),
        scratch_shapes=[pltpu.VMEM((Cout, L), f32)],
    )

    out_flat = pl.pallas_call(
        make_double_conv_bn_kernel(H, W, K, Cin, Cout, center, bs),
        out_shape=jax.ShapeDtypeStruct((N, Cout, HW), f32),
        grid_spec=grid_spec,
        compiler_params=pltpu.CompilerParams(
            dimension_semantics=("parallel",),
            vmem_limit_bytes=32 * 1024 * 1024),
    )(x_pad, w1, w2, w3, pp)

    return out_flat.reshape(N, Cout, H, W)   # back to NCHW (pure reshape)


# ---------------------------------------------------------------------------
# Pure-JAX reference (NCHW, same eval-mode semantics) for a sanity check.
# ---------------------------------------------------------------------------
def reference_forward(x, P, eps=1e-5):
    def conv(x, w, b, pad):
        y = jax.lax.conv_general_dilated(
            x, w, window_strides=(1, 1),
            padding=[(pad, pad), (pad, pad)],
            dimension_numbers=("NCHW", "OIHW", "NCHW"))
        return y + b[None, :, None, None]

    def bn(x, g, be, m, v):
        s = g / jnp.sqrt(v + eps)
        return (x - m[None, :, None, None]) * s[None, :, None, None] \
            + be[None, :, None, None]

    x1 = bn(jax.nn.relu(conv(x, P["w1"], P["b1"], 1)),
            P["g1"], P["be1"], P["m1"], P["v1"])
    identity_full = x1
    x2 = bn(jax.nn.relu(conv(x1, P["w2"], P["b2"], 0)),
            P["g2"], P["be2"], P["m2"], P["v2"]) + identity_full
    identity_1 = x2
    x3 = bn(jax.nn.relu(conv(x2, P["w3"], P["b3"], 1)),
            P["g3"], P["be3"], P["m3"], P["v3"]) + identity_full + identity_1
    return x3


def init_params(key, Cin, Cout, K):
    ks = jax.random.split(key, 24)
    f32 = jnp.float32
    P = {
        "w1": 0.1 * jax.random.normal(ks[0], (Cout, Cin, K, K), f32),
        "b1": 0.1 * jax.random.normal(ks[1], (Cout,), f32),
        "w2": 0.1 * jax.random.normal(ks[2], (Cout, Cout, 1, 1), f32),
        "b2": 0.1 * jax.random.normal(ks[3], (Cout,), f32),
        "w3": 0.1 * jax.random.normal(ks[4], (Cout, Cout, K, K), f32),
        "b3": 0.1 * jax.random.normal(ks[5], (Cout,), f32),
    }
    for i, tag in enumerate(("1", "2", "3")):
        base = 6 + 4 * i
        P["g" + tag] = 1.0 + 0.1 * jax.random.normal(ks[base], (Cout,), f32)
        P["be" + tag] = 0.1 * jax.random.normal(ks[base + 1], (Cout,), f32)
        P["m" + tag] = 0.1 * jax.random.normal(ks[base + 2], (Cout,), f32)
        P["v" + tag] = 0.5 + jax.random.uniform(ks[base + 3], (Cout,), f32)
    return P


if __name__ == "__main__":
    N, Cin, Cout, H, W, K = 2, 4, 8, 16, 16, 3

    key = jax.random.PRNGKey(0)
    kx, kp = jax.random.split(key)
    x = jax.random.normal(kx, (N, Cin, H, W), jnp.float32)
    params = init_params(kp, Cin, Cout, K)

    out = double_conv_bn(x, params, kernel_size=K)
    out = jax.block_until_ready(out)

    ref = reference_forward(x, params)
    assert out.shape == (N, Cout, H, W), out.shape
    assert jnp.allclose(out, ref, rtol=1e-2, atol=1e-2), \
        float(jnp.max(jnp.abs(out - ref)))

    print("KERNEL_OK")
</pallas_src>

<mosaic_0001>
module attributes {stable_mosaic.version = 11 : i64} {
  func.func @kernel(%arg0: i32, %arg1: memref<2x4x512xf32, #tpu.memory_space<vmem>>, %arg2: memref<9x8x4xf32, #tpu.memory_space<vmem>>, %arg3: memref<8x8xf32, #tpu.memory_space<vmem>>, %arg4: memref<9x8x8xf32, #tpu.memory_space<vmem>>, %arg5: memref<8x9xf32, #tpu.memory_space<vmem>>, %arg6: memref<2x8x256xf32, #tpu.memory_space<vmem>>, %arg7: memref<8x512xf32, #tpu.memory_space<vmem>>) attributes {dimension_semantics = [#tpu.dimension_semantics<parallel>], iteration_bounds = array<i64: 1>, scalar_prefetch = 0 : i64, scratch_operands = 1 : i64, tpu.core_type = #tpu.core_type<tc>, window_params = [{transform_indices = @transform_0, window_bounds = array<i64: 2, 4, 512>}, {pipeline_mode = #tpu.pipeline_mode<synchronous>, transform_indices = @transform_1, window_bounds = array<i64: 9, 8, 4>}, {pipeline_mode = #tpu.pipeline_mode<synchronous>, transform_indices = @transform_2, window_bounds = array<i64: 8, 8>}, {pipeline_mode = #tpu.pipeline_mode<synchronous>, transform_indices = @transform_3, window_bounds = array<i64: 9, 8, 8>}, {pipeline_mode = #tpu.pipeline_mode<synchronous>, transform_indices = @transform_4, window_bounds = array<i64: 8, 9>}, {transform_indices = @transform_5, window_bounds = array<i64: 2, 8, 256>}]} {
    %0 = tpu.iota {dimensions = array<i32: 1>} : vector<1x256xi32>
    %c15_i32 = arith.constant 15 : i32
    %1 = vector.broadcast %c15_i32 : i32 to vector<1x256xi32>
    %2 = arith.andi %0, %1 : vector<1x256xi32>
    %c1_i32 = arith.constant 1 : i32
    %3 = vector.broadcast %c1_i32 : i32 to vector<1x256xi32>
    %4 = arith.cmpi sge, %2, %3 : vector<1x256xi32>
    %c15_i32_0 = arith.constant 15 : i32
    %5 = vector.broadcast %c15_i32_0 : i32 to vector<1x256xi32>
    %6 = arith.cmpi slt, %2, %5 : vector<1x256xi32>
    %cst = arith.constant 0.000000e+00 : f32
    %7 = vector.broadcast %cst : f32 to vector<8x128xf32>
    %c0 = arith.constant 0 : index
    %c0_1 = arith.constant 0 : index
    %8 = vector.load %arg7[%c0, %c0_1] : memref<8x512xf32, #tpu.memory_space<vmem>>, vector<8x128xf32>
    tpu.vector_store %arg7[%c0, %c0_1], %7 {strides = array<i32>} : memref<8x512xf32, #tpu.memory_space<vmem>>, vector<8x128xf32>,
    %cst_2 = arith.constant 0.000000e+00 : f32
    %9 = vector.broadcast %cst_2 : f32 to vector<8x128xf32>
    %c0_3 = arith.constant 0 : index
    %c384 = arith.constant 384 : index
    %10 = vector.load %arg7[%c0_3, %c384] : memref<8x512xf32, #tpu.memory_space<vmem>>, vector<8x128xf32>
    tpu.vector_store %arg7[%c0_3, %c384], %9 {strides = array<i32>} : memref<8x512xf32, #tpu.memory_space<vmem>>, vector<8x128xf32>,
    %c0_4 = arith.constant 0 : index
    %c0_5 = arith.constant 0 : index
    %11 = vector.load %arg5[%c0_4, %c0_5] : memref<8x9xf32, #tpu.memory_space<vmem>>, vector<8x1xf32>
    %c0_6 = arith.constant 0 : index
    %c1 = arith.constant 1 : index
    %12 = vector.load %arg5[%c0_6, %c1] : memref<8x9xf32, #tpu.memory_space<vmem>>, vector<8x1xf32>
    %c0_7 = arith.constant 0 : index
    %c2 = arith.constant 2 : index
    %13 = vector.load %arg5[%c0_7, %c2] : memref<8x9xf32, #tpu.memory_space<vmem>>, vector<8x1xf32>
    %c0_8 = arith.constant 0 : index
    %c3 = arith.constant 3 : index
    %14 = vector.load %arg5[%c0_8, %c3] : memref<8x9xf32, #tpu.memory_space<vmem>>, vector<8x1xf32>
    %c0_9 = arith.constant 0 : index
    %c4 = arith.constant 4 : index
    %15 = vector.load %arg5[%c0_9, %c4] : memref<8x9xf32, #tpu.memory_space<vmem>>, vector<8x1xf32>
    %c0_10 = arith.constant 0 : index
    %c5 = arith.constant 5 : index
    %16 = vector.load %arg5[%c0_10, %c5] : memref<8x9xf32, #tpu.memory_space<vmem>>, vector<8x1xf32>
    %c0_11 = arith.constant 0 : index
    %c6 = arith.constant 6 : index
    %17 = vector.load %arg5[%c0_11, %c6] : memref<8x9xf32, #tpu.memory_space<vmem>>, vector<8x1xf32>
    %c0_12 = arith.constant 0 : index
    %c7 = arith.constant 7 : index
    %18 = vector.load %arg5[%c0_12, %c7] : memref<8x9xf32, #tpu.memory_space<vmem>>, vector<8x1xf32>
    %c0_13 = arith.constant 0 : index
    %c8 = arith.constant 8 : index
    %19 = vector.load %arg5[%c0_13, %c8] : memref<8x9xf32, #tpu.memory_space<vmem>>, vector<8x1xf32>
    %c0_14 = arith.constant 0 : index
    %c0_15 = arith.constant 0 : index
    %c0_16 = arith.constant 0 : index
    %20 = vector.load %arg2[%c0_14, %c0_15, %c0_16] : memref<9x8x4xf32, #tpu.memory_space<vmem>>, vector<1x8x4xf32>
    %21 = vector.shape_cast %20 : vector<1x8x4xf32> to vector<8x4xf32>
    %c0_17 = arith.constant 0 : index
    %c0_18 = arith.constant 0 : index
    %c111 = arith.constant 111 : index
    %22 = vector.load %arg1[%c0_17, %c0_18, %c111] : memref<2x4x512xf32, #tpu.memory_space<vmem>>, vector<1x4x256xf32>
    %23 = vector.shape_cast %22 : vector<1x4x256xf32> to vector<4x256xf32>
    %cst_19 = arith.constant dense<0.000000e+00> : vector<8x256xf32>
    %24 = tpu.matmul %21, %23, %cst_19 {dimension_numbers = #tpu.dot_dimension_numbers<[1], [0], [0], [1], [0, 0, 1, 1], [], []>} : vector<8x4xf32>, vector<4x256xf32>, vector<8x256xf32> -> vector<8x256xf32>
    %c3_20 = arith.constant 3 : index
    %c0_21 = arith.constant 0 : index
    %c0_22 = arith.constant 0 : index
    %25 = vector.load %arg2[%c3_20, %c0_21, %c0_22] : memref<9x8x4xf32, #tpu.memory_space<vmem>>, vector<1x8x4xf32>
    %26 = vector.shape_cast %25 : vector<1x8x4xf32> to vector<8x4xf32>
    %c0_23 = arith.constant 0 : index
    %c0_24 = arith.constant 0 : index
    %c127 = arith.constant 127 : index
    %27 = vector.load %arg1[%c0_23, %c0_24, %c127] : memref<2x4x512xf32, #tpu.memory_space<vmem>>, vector<1x4x256xf32>
    %28 = vector.shape_cast %27 : vector<1x4x256xf32> to vector<4x256xf32>
    %cst_25 = arith.constant dense<0.000000e+00> : vector<8x256xf32>
    %29 = tpu.matmul %26, %28, %cst_25 {dimension_numbers = #tpu.dot_dimension_numbers<[1], [0], [0], [1], [0, 0, 1, 1], [], []>} : vector<8x4xf32>, vector<4x256xf32>, vector<8x256xf32> -> vector<8x256xf32>
    %30 = arith.addf %24, %29 : vector<8x256xf32>
    %c6_26 = arith.constant 6 : index
    %c0_27 = arith.constant 0 : index
    %c0_28 = arith.constant 0 : index
    %31 = vector.load %arg2[%c6_26, %c0_27, %c0_28] : memref<9x8x4xf32, #tpu.memory_space<vmem>>, vector<1x8x4xf32>
    %32 = vector.shape_cast %31 : vector<1x8x4xf32> to vector<8x4xf32>
    %c0_29 = arith.constant 0 : index
    %c0_30 = arith.constant 0 : index
    %c143 = arith.constant 143 : index
    %33 = vector.load %arg1[%c0_29, %c0_30, %c143] : memref<2x4x512xf32, #tpu.memory_space<vmem>>, vector<1x4x256xf32>
    %34 = vector.shape_cast %33 : vector<1x4x256xf32> to vector<4x256xf32>
    %cst_31 = arith.constant dense<0.000000e+00> : vector<8x256xf32>
    %35 = tpu.matmul %32, %34, %cst_31 {dimension_numbers = #tpu.dot_dimension_numbers<[1], [0], [0], [1], [0, 0, 1, 1], [], []>} : vector<8x4xf32>, vector<4x256xf32>, vector<8x256xf32> -> vector<8x256xf32>
    %36 = arith.addf %30, %35 : vector<8x256xf32>
    %cst_32 = arith.constant 0.000000e+00 : f32
    %37 = vector.shape_cast %4 : vector<1x256xi1> to vector<1x256xi1>
    %38 = vector.broadcast %37 : vector<1x256xi1> to vector<8x256xi1>
    %39 = vector.broadcast %cst_32 : f32 to vector<8x256xf32>
    %40 = arith.select %38, %36, %39 : vector<8x256xi1>, vector<8x256xf32>
    %c1_33 = arith.constant 1 : index
    %c0_34 = arith.constant 0 : index
    %c0_35 = arith.constant 0 : index
    %41 = vector.load %arg2[%c1_33, %c0_34, %c0_35] : memref<9x8x4xf32, #tpu.memory_space<vmem>>, vector<1x8x4xf32>
    %42 = vector.shape_cast %41 : vector<1x8x4xf32> to vector<8x4xf32>
    %c0_36 = arith.constant 0 : index
    %c0_37 = arith.constant 0 : index
    %c112 = arith.constant 112 : index
    %43 = vector.load %arg1[%c0_36, %c0_37, %c112] : memref<2x4x512xf32, #tpu.memory_space<vmem>>, vector<1x4x256xf32>
    %44 = vector.shape_cast %43 : vector<1x4x256xf32> to vector<4x256xf32>
    %cst_38 = arith.constant dense<0.000000e+00> : vector<8x256xf32>
    %45 = tpu.matmul %42, %44, %cst_38 {dimension_numbers = #tpu.dot_dimension_numbers<[1], [0], [0], [1], [0, 0, 1, 1], [], []>} : vector<8x4xf32>, vector<4x256xf32>, vector<8x256xf32> -> vector<8x256xf32>
    %c4_39 = arith.constant 4 : index
    %c0_40 = arith.constant 0 : index
    %c0_41 = arith.constant 0 : index
    %46 = vector.load %arg2[%c4_39, %c0_40, %c0_41] : memref<9x8x4xf32, #tpu.memory_space<vmem>>, vector<1x8x4xf32>
    %47 = vector.shape_cast %46 : vector<1x8x4xf32> to vector<8x4xf32>
    %c0_42 = arith.constant 0 : index
    %c0_43 = arith.constant 0 : index
    %c128 = arith.constant 128 : index
    %48 = vector.load %arg1[%c0_42, %c0_43, %c128] : memref<2x4x512xf32, #tpu.memory_space<vmem>>, vector<1x4x256xf32>
    %49 = vector.shape_cast %48 : vector<1x4x256xf32> to vector<4x256xf32>
    %cst_44 = arith.constant dense<0.000000e+00> : vector<8x256xf32>
    %50 = tpu.matmul %47, %49, %cst_44 {dimension_numbers = #tpu.dot_dimension_numbers<[1], [0], [0], [1], [0, 0, 1, 1], [], []>} : vector<8x4xf32>, vector<4x256xf32>, vector<8x256xf32> -> vector<8x256xf32>
    %51 = arith.addf %45, %50 : vector<8x256xf32>
    %c7_45 = arith.constant 7 : index
    %c0_46 = arith.constant 0 : index
    %c0_47 = arith.constant 0 : index
    %52 = vector.load %arg2[%c7_45, %c0_46, %c0_47] : memref<9x8x4xf32, #tpu.memory_space<vmem>>, vector<1x8x4xf32>
    %53 = vector.shape_cast %52 : vector<1x8x4xf32> to vector<8x4xf32>
    %c0_48 = arith.constant 0 : index
    %c0_49 = arith.constant 0 : index
    %c144 = arith.constant 144 : index
    %54 = vector.load %arg1[%c0_48, %c0_49, %c144] : memref<2x4x512xf32, #tpu.memory_space<vmem>>, vector<1x4x256xf32>
    %55 = vector.shape_cast %54 : vector<1x4x256xf32> to vector<4x256xf32>
    %cst_50 = arith.constant dense<0.000000e+00> : vector<8x256xf32>
    %56 = tpu.matmul %53, %55, %cst_50 {dimension_numbers = #tpu.dot_dimension_numbers<[1], [0], [0], [1], [0, 0, 1, 1], [], []>} : vector<8x4xf32>, vector<4x256xf32>, vector<8x256xf32> -> vector<8x256xf32>
    %57 = arith.addf %51, %56 : vector<8x256xf32>
    %58 = arith.addf %40, %57 : vector<8x256xf32>
    %c2_51 = arith.constant 2 : index
    %c0_52 = arith.constant 0 : index
    %c0_53 = arith.constant 0 : index
    %59 = vector.load %arg2[%c2_51, %c0_52, %c0_53] : memref<9x8x4xf32, #tpu.memory_space<vmem>>, vector<1x8x4xf32>
    %60 = vector.shape_cast %59 : vector<1x8x4xf32> to vector<8x4xf32>
    %c0_54 = arith.constant 0 : index
    %c0_55 = arith.constant 0 : index
    %c113 = arith.constant 113 : index
    %61 = vector.load %arg1[%c0_54, %c0_55, %c113] : memref<2x4x512xf32, #tpu.memory_space<vmem>>, vector<1x4x256xf32>
    %62 = vector.shape_cast %61 : vector<1x4x256xf32> to vector<4x256xf32>
    %cst_56 = arith.constant dense<0.000000e+00> : vector<8x256xf32>
    %63 = tpu.matmul %60, %62, %cst_56 {dimension_numbers = #tpu.dot_dimension_numbers<[1], [0], [0], [1], [0, 0, 1, 1], [], []>} : vector<8x4xf32>, vector<4x256xf32>, vector<8x256xf32> -> vector<8x256xf32>
    %c5_57 = arith.constant 5 : index
    %c0_58 = arith.constant 0 : index
    %c0_59 = arith.constant 0 : index
    %64 = vector.load %arg2[%c5_57, %c0_58, %c0_59] : memref<9x8x4xf32, #tpu.memory_space<vmem>>, vector<1x8x4xf32>
    %65 = vector.shape_cast %64 : vector<1x8x4xf32> to vector<8x4xf32>
    %c0_60 = arith.constant 0 : index
    %c0_61 = arith.constant 0 : index
    %c129 = arith.constant 129 : index
    %66 = vector.load %arg1[%c0_60, %c0_61, %c129] : memref<2x4x512xf32, #tpu.memory_space<vmem>>, vector<1x4x256xf32>
    %67 = vector.shape_cast %66 : vector<1x4x256xf32> to vector<4x256xf32>
    %cst_62 = arith.constant dense<0.000000e+00> : vector<8x256xf32>
    %68 = tpu.matmul %65, %67, %cst_62 {dimension_numbers = #tpu.dot_dimension_numbers<[1], [0], [0], [1], [0, 0, 1, 1], [], []>} : vector<8x4xf32>, vector<4x256xf32>, vector<8x256xf32> -> vector<8x256xf32>
    %69 = arith.addf %63, %68 : vector<8x256xf32>
    %c8_63 = arith.constant 8 : index
    %c0_64 = arith.constant 0 : index
    %c0_65 = arith.constant 0 : index
    %70 = vector.load %arg2[%c8_63, %c0_64, %c0_65] : memref<9x8x4xf32, #tpu.memory_space<vmem>>, vector<1x8x4xf32>
    %71 = vector.shape_cast %70 : vector<1x8x4xf32> to vector<8x4xf32>
    %c0_66 = arith.constant 0 : index
    %c0_67 = arith.constant 0 : index
    %c145 = arith.constant 145 : index
    %72 = vector.load %arg1[%c0_66, %c0_67, %c145] : memref<2x4x512xf32, #tpu.memory_space<vmem>>, vector<1x4x256xf32>
    %73 = vector.shape_cast %72 : vector<1x4x256xf32> to vector<4x256xf32>
    %cst_68 = arith.constant dense<0.000000e+00> : vector<8x256xf32>
    %74 = tpu.matmul %71, %73, %cst_68 {dimension_numbers = #tpu.dot_dimension_numbers<[1], [0], [0], [1], [0, 0, 1, 1], [], []>} : vector<8x4xf32>, vector<4x256xf32>, vector<8x256xf32> -> vector<8x256xf32>
    %75 = arith.addf %69, %74 : vector<8x256xf32>
    %cst_69 = arith.constant 0.000000e+00 : f32
    %76 = vector.shape_cast %6 : vector<1x256xi1> to vector<1x256xi1>
    %77 = vector.broadcast %76 : vector<1x256xi1> to vector<8x256xi1>
    %78 = vector.broadcast %cst_69 : f32 to vector<8x256xf32>
    %79 = arith.select %77, %75, %78 : vector<8x256xi1>, vector<8x256xf32>
    %80 = arith.addf %58, %79 : vector<8x256xf32>
    %81 = vector.broadcast %11 : vector<8x1xf32> to vector<8x256xf32>
    %82 = arith.addf %80, %81 : vector<8x256xf32>
    %cst_70 = arith.constant 0.000000e+00 : f32
    %83 = vector.broadcast %cst_70 : f32 to vector<8x256xf32>
    %84 = arith.maximumf %82, %83 : vector<8x256xf32>
    %85 = vector.broadcast %12 : vector<8x1xf32> to vector<8x256xf32>
    %86 = arith.mulf %84, %85 : vector<8x256xf32>
    %87 = vector.broadcast %13 : vector<8x1xf32> to vector<8x256xf32>
    %88 = arith.addf %86, %87 : vector<8x256xf32>
    %c0_71 = arith.constant 0 : index
    %c0_72 = arith.constant 0 : index
    %89 = vector.load %arg3[%c0_71, %c0_72] : memref<8x8xf32, #tpu.memory_space<vmem>>, vector<8x8xf32>
    %cst_73 = arith.constant dense<0.000000e+00> : vector<8x256xf32>
    %90 = tpu.matmul %89, %88, %cst_73 {dimension_numbers = #tpu.dot_dimension_numbers<[1], [0], [0], [1], [0, 0, 1, 1], [], []>} : vector<8x8xf32>, vector<8x256xf32>, vector<8x256xf32> -> vector<8x256xf32>
    %91 = vector.broadcast %14 : vector<8x1xf32> to vector<8x256xf32>
    %92 = arith.addf %90, %91 : vector<8x256xf32>
    %cst_74 = arith.constant 0.000000e+00 : f32
    %93 = vector.broadcast %cst_74 : f32 to vector<8x256xf32>
    %94 = arith.maximumf %92, %93 : vector<8x256xf32>
    %95 = vector.broadcast %15 : vector<8x1xf32> to vector<8x256xf32>
    %96 = arith.mulf %94, %95 : vector<8x256xf32>
    %97 = vector.broadcast %16 : vector<8x1xf32> to vector<8x256xf32>
    %98 = arith.addf %96, %97 : vector<8x256xf32>
    %99 = arith.addf %98, %88 : vector<8x256xf32>
    %c0_75 = arith.constant 0 : index
    %c128_76 = arith.constant 128 : index
    %100 = vector.load %arg7[%c0_75, %c128_76] : memref<8x512xf32, #tpu.memory_space<vmem>>, vector<8x256xf32>
    tpu.vector_store %arg7[%c0_75, %c128_76], %99 {strides = array<i32>} : memref<8x512xf32, #tpu.memory_space<vmem>>, vector<8x256xf32>,
    %c0_77 = arith.constant 0 : index
    %c0_78 = arith.constant 0 : index
    %c0_79 = arith.constant 0 : index
    %101 = vector.load %arg4[%c0_77, %c0_78, %c0_79] : memref<9x8x8xf32, #tpu.memory_space<vmem>>, vector<1x8x8xf32>
    %102 = vector.shape_cast %101 : vector<1x8x8xf32> to vector<8x8xf32>
    %c0_80 = arith.constant 0 : index
    %c111_81 = arith.constant 111 : index
    %103 = vector.load %arg7[%c0_80, %c111_81] : memref<8x512xf32, #tpu.memory_space<vmem>>, vector<8x256xf32>
    %cst_82 = arith.constant dense<0.000000e+00> : vector<8x256xf32>
    %104 = tpu.matmul %102, %103, %cst_82 {dimension_numbers = #tpu.dot_dimension_numbers<[1], [0], [0], [1], [0, 0, 1, 1], [], []>} : vector<8x8xf32>, vector<8x256xf32>, vector<8x256xf32> -> vector<8x256xf32>
    %c3_83 = arith.constant 3 : index
    %c0_84 = arith.constant 0 : index
    %c0_85 = arith.constant 0 : index
    %105 = vector.load %arg4[%c3_83, %c0_84, %c0_85] : memref<9x8x8xf32, #tpu.memory_space<vmem>>, vector<1x8x8xf32>
    %106 = vector.shape_cast %105 : vector<1x8x8xf32> to vector<8x8xf32>
    %c0_86 = arith.constant 0 : index
    %c127_87 = arith.constant 127 : index
    %107 = vector.load %arg7[%c0_86, %c127_87] : memref<8x512xf32, #tpu.memory_space<vmem>>, vector<8x256xf32>
    %cst_88 = arith.constant dense<0.000000e+00> : vector<8x256xf32>
    %108 = tpu.matmul %106, %107, %cst_88 {dimension_numbers = #tpu.dot_dimension_numbers<[1], [0], [0], [1], [0, 0, 1, 1], [], []>} : vector<8x8xf32>, vector<8x256xf32>, vector<8x256xf32> -> vector<8x256xf32>
    %109 = arith.addf %104, %108 : vector<8x256xf32>
    %c6_89 = arith.constant 6 : index
    %c0_90 = arith.constant 0 : index
    %c0_91 = arith.constant 0 : index
    %110 = vector.load %arg4[%c6_89, %c0_90, %c0_91] : memref<9x8x8xf32, #tpu.memory_space<vmem>>, vector<1x8x8xf32>
    %111 = vector.shape_cast %110 : vector<1x8x8xf32> to vector<8x8xf32>
    %c0_92 = arith.constant 0 : index
    %c143_93 = arith.constant 143 : index
    %112 = vector.load %arg7[%c0_92, %c143_93] : memref<8x512xf32, #tpu.memory_space<vmem>>, vector<8x256xf32>
    %cst_94 = arith.constant dense<0.000000e+00> : vector<8x256xf32>
    %113 = tpu.matmul %111, %112, %cst_94 {dimension_numbers = #tpu.dot_dimension_numbers<[1], [0], [0], [1], [0, 0, 1, 1], [], []>} : vector<8x8xf32>, vector<8x256xf32>, vector<8x256xf32> -> vector<8x256xf32>
    %114 = arith.addf %109, %113 : vector<8x256xf32>
    %cst_95 = arith.constant 0.000000e+00 : f32
    %115 = vector.shape_cast %4 : vector<1x256xi1> to vector<1x256xi1>
    %116 = vector.broadcast %115 : vector<1x256xi1> to vector<8x256xi1>
    %117 = vector.broadcast %cst_95 : f32 to vector<8x256xf32>
    %118 = arith.select %116, %114, %117 : vector<8x256xi1>, vector<8x256xf32>
    %c1_96 = arith.constant 1 : index
    %c0_97 = arith.constant 0 : index
    %c0_98 = arith.constant 0 : index
    %119 = vector.load %arg4[%c1_96, %c0_97, %c0_98] : memref<9x8x8xf32, #tpu.memory_space<vmem>>, vector<1x8x8xf32>
    %120 = vector.shape_cast %119 : vector<1x8x8xf32> to vector<8x8xf32>
    %c0_99 = arith.constant 0 : index
    %c112_100 = arith.constant 112 : index
    %121 = vector.load %arg7[%c0_99, %c112_100] : memref<8x512xf32, #tpu.memory_space<vmem>>, vector<8x256xf32>
    %cst_101 = arith.constant dense<0.000000e+00> : vector<8x256xf32>
    %122 = tpu.matmul %120, %121, %cst_101 {dimension_numbers = #tpu.dot_dimension_numbers<[1], [0], [0], [1], [0, 0, 1, 1], [], []>} : vector<8x8xf32>, vector<8x256xf32>, vector<8x256xf32> -> vector<8x256xf32>
    %c4_102 = arith.constant 4 : index
    %c0_103 = arith.constant 0 : index
    %c0_104 = arith.constant 0 : index
    %123 = vector.load %arg4[%c4_102, %c0_103, %c0_104] : memref<9x8x8xf32, #tpu.memory_space<vmem>>, vector<1x8x8xf32>
    %124 = vector.shape_cast %123 : vector<1x8x8xf32> to vector<8x8xf32>
    %c0_105 = arith.constant 0 : index
    %c128_106 = arith.constant 128 : index
    %125 = vector.load %arg7[%c0_105, %c128_106] : memref<8x512xf32, #tpu.memory_space<vmem>>, vector<8x256xf32>
    %cst_107 = arith.constant dense<0.000000e+00> : vector<8x256xf32>
    %126 = tpu.matmul %124, %125, %cst_107 {dimension_numbers = #tpu.dot_dimension_numbers<[1], [0], [0], [1], [0, 0, 1, 1], [], []>} : vector<8x8xf32>, vector<8x256xf32>, vector<8x256xf32> -> vector<8x256xf32>
    %127 = arith.addf %122, %126 : vector<8x256xf32>
    %c7_108 = arith.constant 7 : index
    %c0_109 = arith.constant 0 : index
    %c0_110 = arith.constant 0 : index
    %128 = vector.load %arg4[%c7_108, %c0_109, %c0_110] : memref<9x8x8xf32, #tpu.memory_space<vmem>>, vector<1x8x8xf32>
    %129 = vector.shape_cast %128 : vector<1x8x8xf32> to vector<8x8xf32>
    %c0_111 = arith.constant 0 : index
    %c144_112 = arith.constant 144 : index
    %130 = vector.load %arg7[%c0_111, %c144_112] : memref<8x512xf32, #tpu.memory_space<vmem>>, vector<8x256xf32>
    %cst_113 = arith.constant dense<0.000000e+00> : vector<8x256xf32>
    %131 = tpu.matmul %129, %130, %cst_113 {dimension_numbers = #tpu.dot_dimension_numbers<[1], [0], [0], [1], [0, 0, 1, 1], [], []>} : vector<8x8xf32>, vector<8x256xf32>, vector<8x256xf32> -> vector<8x256xf32>
    %132 = arith.addf %127, %131 : vector<8x256xf32>
    %133 = arith.addf %118, %132 : vector<8x256xf32>
    %c2_114 = arith.constant 2 : index
    %c0_115 = arith.constant 0 : index
    %c0_116 = arith.constant 0 : index
    %134 = vector.load %arg4[%c2_114, %c0_115, %c0_116] : memref<9x8x8xf32, #tpu.memory_space<vmem>>, vector<1x8x8xf32>
    %135 = vector.shape_cast %134 : vector<1x8x8xf32> to vector<8x8xf32>
    %c0_117 = arith.constant 0 : index
    %c113_118 = arith.constant 113 : index
    %136 = vector.load %arg7[%c0_117, %c113_118] : memref<8x512xf32, #tpu.memory_space<vmem>>, vector<8x256xf32>
    %cst_119 = arith.constant dense<0.000000e+00> : vector<8x256xf32>
    %137 = tpu.matmul %135, %136, %cst_119 {dimension_numbers = #tpu.dot_dimension_numbers<[1], [0], [0], [1], [0, 0, 1, 1], [], []>} : vector<8x8xf32>, vector<8x256xf32>, vector<8x256xf32> -> vector<8x256xf32>
    %c5_120 = arith.constant 5 : index
    %c0_121 = arith.constant 0 : index
    %c0_122 = arith.constant 0 : index
    %138 = vector.load %arg4[%c5_120, %c0_121, %c0_122] : memref<9x8x8xf32, #tpu.memory_space<vmem>>, vector<1x8x8xf32>
    %139 = vector.shape_cast %138 : vector<1x8x8xf32> to vector<8x8xf32>
    %c0_123 = arith.constant 0 : index
    %c129_124 = arith.constant 129 : index
    %140 = vector.load %arg7[%c0_123, %c129_124] : memref<8x512xf32, #tpu.memory_space<vmem>>, vector<8x256xf32>
    %cst_125 = arith.constant dense<0.000000e+00> : vector<8x256xf32>
    %141 = tpu.matmul %139, %140, %cst_125 {dimension_numbers = #tpu.dot_dimension_numbers<[1], [0], [0], [1], [0, 0, 1, 1], [], []>} : vector<8x8xf32>, vector<8x256xf32>, vector<8x256xf32> -> vector<8x256xf32>
    %142 = arith.addf %137, %141 : vector<8x256xf32>
    %c8_126 = arith.constant 8 : index
    %c0_127 = arith.constant 0 : index
    %c0_128 = arith.constant 0 : index
    %143 = vector.load %arg4[%c8_126, %c0_127, %c0_128] : memref<9x8x8xf32, #tpu.memory_space<vmem>>, vector<1x8x8xf32>
    %144 = vector.shape_cast %143 : vector<1x8x8xf32> to vector<8x8xf32>
    %c0_129 = arith.constant 0 : index
    %c145_130 = arith.constant 145 : index
    %145 = vector.load %arg7[%c0_129, %c145_130] : memref<8x512xf32, #tpu.memory_space<vmem>>, vector<8x256xf32>
    %cst_131 = arith.constant dense<0.000000e+00> : vector<8x256xf32>
    %146 = tpu.matmul %144, %145, %cst_131 {dimension_numbers = #tpu.dot_dimension_numbers<[1], [0], [0], [1], [0, 0, 1, 1], [], []>} : vector<8x8xf32>, vector<8x256xf32>, vector<8x256xf32> -> vector<8x256xf32>
    %147 = arith.addf %142, %146 : vector<8x256xf32>
    %cst_132 = arith.constant 0.000000e+00 : f32
    %148 = vector.shape_cast %6 : vector<1x256xi1> to vector<1x256xi1>
    %149 = vector.broadcast %148 : vector<1x256xi1> to vector<8x256xi1>
    %150 = vector.broadcast %cst_132 : f32 to vector<8x256xf32>
    %151 = arith.select %149, %147, %150 : vector<8x256xi1>, vector<8x256xf32>
    %152 = arith.addf %133, %151 : vector<8x256xf32>
    %153 = vector.broadcast %17 : vector<8x1xf32> to vector<8x256xf32>
    %154 = arith.addf %152, %153 : vector<8x256xf32>
    %cst_133 = arith.constant 0.000000e+00 : f32
    %155 = vector.broadcast %cst_133 : f32 to vector<8x256xf32>
    %156 = arith.maximumf %154, %155 : vector<8x256xf32>
    %157 = vector.broadcast %18 : vector<8x1xf32> to vector<8x256xf32>
    %158 = arith.mulf %156, %157 : vector<8x256xf32>
    %159 = vector.broadcast %19 : vector<8x1xf32> to vector<8x256xf32>
    %160 = arith.addf %158, %159 : vector<8x256xf32>
    %161 = arith.addf %160, %88 : vector<8x256xf32>
    %162 = arith.addf %161, %99 : vector<8x256xf32>
    %c0_134 = arith.constant 0 : index
    %c0_135 = arith.constant 0 : index
    %c0_136 = arith.constant 0 : index
    %163 = vector.load %arg6[%c0_134, %c0_135, %c0_136] : memref<2x8x256xf32, #tpu.memory_space<vmem>>, vector<1x8x256xf32>
    %164 = vector.shape_cast %163 : vector<1x8x256xf32> to vector<8x256xf32>
    %165 = vector.shape_cast %162 : vector<8x256xf32> to vector<1x8x256xf32>
    tpu.vector_store %arg6[%c0_134, %c0_135, %c0_136], %165 {strides = array<i32>} : memref<2x8x256xf32, #tpu.memory_space<vmem>>, vector<1x8x256xf32>,
    %c0_137 = arith.constant 0 : index
    %c0_138 = arith.constant 0 : index
    %c0_139 = arith.constant 0 : index
    %166 = vector.load %arg2[%c0_137, %c0_138, %c0_139] : memref<9x8x4xf32, #tpu.memory_space<vmem>>, vector<1x8x4xf32>
    %167 = vector.shape_cast %166 : vector<1x8x4xf32> to vector<8x4xf32>
    %c1_140 = arith.constant 1 : index
    %c0_141 = arith.constant 0 : index
    %c111_142 = arith.constant 111 : index
    %168 = vector.load %arg1[%c1_140, %c0_141, %c111_142] : memref<2x4x512xf32, #tpu.memory_space<vmem>>, vector<1x4x256xf32>
    %169 = vector.shape_cast %168 : vector<1x4x256xf32> to vector<4x256xf32>
    %cst_143 = arith.constant dense<0.000000e+00> : vector<8x256xf32>
    %170 = tpu.matmul %167, %169, %cst_143 {dimension_numbers = #tpu.dot_dimension_numbers<[1], [0], [0], [1], [0, 0, 1, 1], [], []>} : vector<8x4xf32>, vector<4x256xf32>, vector<8x256xf32> -> vector<8x256xf32>
    %c3_144 = arith.constant 3 : index
    %c0_145 = arith.constant 0 : index
    %c0_146 = arith.constant 0 : index
    %171 = vector.load %arg2[%c3_144, %c0_145, %c0_146] : memref<9x8x4xf32, #tpu.memory_space<vmem>>, vector<1x8x4xf32>
    %172 = vector.shape_cast %171 : vector<1x8x4xf32> to vector<8x4xf32>
    %c1_147 = arith.constant 1 : index
    %c0_148 = arith.constant 0 : index
    %c127_149 = arith.constant 127 : index
    %173 = vector.load %arg1[%c1_147, %c0_148, %c127_149] : memref<2x4x512xf32, #tpu.memory_space<vmem>>, vector<1x4x256xf32>
    %174 = vector.shape_cast %173 : vector<1x4x256xf32> to vector<4x256xf32>
    %cst_150 = arith.constant dense<0.000000e+00> : vector<8x256xf32>
    %175 = tpu.matmul %172, %174, %cst_150 {dimension_numbers = #tpu.dot_dimension_numbers<[1], [0], [0], [1], [0, 0, 1, 1], [], []>} : vector<8x4xf32>, vector<4x256xf32>, vector<8x256xf32> -> vector<8x256xf32>
    %176 = arith.addf %170, %175 : vector<8x256xf32>
    %c6_151 = arith.constant 6 : index
    %c0_152 = arith.constant 0 : index
    %c0_153 = arith.constant 0 : index
    %177 = vector.load %arg2[%c6_151, %c0_152, %c0_153] : memref<9x8x4xf32, #tpu.memory_space<vmem>>, vector<1x8x4xf32>
    %178 = vector.shape_cast %177 : vector<1x8x4xf32> to vector<8x4xf32>
    %c1_154 = arith.constant 1 : index
    %c0_155 = arith.constant 0 : index
    %c143_156 = arith.constant 143 : index
    %179 = vector.load %arg1[%c1_154, %c0_155, %c143_156] : memref<2x4x512xf32, #tpu.memory_space<vmem>>, vector<1x4x256xf32>
    %180 = vector.shape_cast %179 : vector<1x4x256xf32> to vector<4x256xf32>
    %cst_157 = arith.constant dense<0.000000e+00> : vector<8x256xf32>
    %181 = tpu.matmul %178, %180, %cst_157 {dimension_numbers = #tpu.dot_dimension_numbers<[1], [0], [0], [1], [0, 0, 1, 1], [], []>} : vector<8x4xf32>, vector<4x256xf32>, vector<8x256xf32> -> vector<8x256xf32>
    %182 = arith.addf %176, %181 : vector<8x256xf32>
    %cst_158 = arith.constant 0.000000e+00 : f32
    %183 = vector.shape_cast %4 : vector<1x256xi1> to vector<1x256xi1>
    %184 = vector.broadcast %183 : vector<1x256xi1> to vector<8x256xi1>
    %185 = vector.broadcast %cst_158 : f32 to vector<8x256xf32>
    %186 = arith.select %184, %182, %185 : vector<8x256xi1>, vector<8x256xf32>
    %c1_159 = arith.constant 1 : index
    %c0_160 = arith.constant 0 : index
    %c0_161 = arith.constant 0 : index
    %187 = vector.load %arg2[%c1_159, %c0_160, %c0_161] : memref<9x8x4xf32, #tpu.memory_space<vmem>>, vector<1x8x4xf32>
    %188 = vector.shape_cast %187 : vector<1x8x4xf32> to vector<8x4xf32>
    %c1_162 = arith.constant 1 : index
    %c0_163 = arith.constant 0 : index
    %c112_164 = arith.constant 112 : index
    %189 = vector.load %arg1[%c1_162, %c0_163, %c112_164] : memref<2x4x512xf32, #tpu.memory_space<vmem>>, vector<1x4x256xf32>
    %190 = vector.shape_cast %189 : vector<1x4x256xf32> to vector<4x256xf32>
    %cst_165 = arith.constant dense<0.000000e+00> : vector<8x256xf32>
    %191 = tpu.matmul %188, %190, %cst_165 {dimension_numbers = #tpu.dot_dimension_numbers<[1], [0], [0], [1], [0, 0, 1, 1], [], []>} : vector<8x4xf32>, vector<4x256xf32>, vector<8x256xf32> -> vector<8x256xf32>
    %c4_166 = arith.constant 4 : index
    %c0_167 = arith.constant 0 : index
    %c0_168 = arith.constant 0 : index
    %192 = vector.load %arg2[%c4_166, %c0_167, %c0_168] : memref<9x8x4xf32, #tpu.memory_space<vmem>>, vector<1x8x4xf32>
    %193 = vector.shape_cast %192 : vector<1x8x4xf32> to vector<8x4xf32>
    %c1_169 = arith.constant 1 : index
    %c0_170 = arith.constant 0 : index
    %c128_171 = arith.constant 128 : index
    %194 = vector.load %arg1[%c1_169, %c0_170, %c128_171] : memref<2x4x512xf32, #tpu.memory_space<vmem>>, vector<1x4x256xf32>
    %195 = vector.shape_cast %194 : vector<1x4x256xf32> to vector<4x256xf32>
    %cst_172 = arith.constant dense<0.000000e+00> : vector<8x256xf32>
    %196 = tpu.matmul %193, %195, %cst_172 {dimension_numbers = #tpu.dot_dimension_numbers<[1], [0], [0], [1], [0, 0, 1, 1], [], []>} : vector<8x4xf32>, vector<4x256xf32>, vector<8x256xf32> -> vector<8x256xf32>
    %197 = arith.addf %191, %196 : vector<8x256xf32>
    %c7_173 = arith.constant 7 : index
    %c0_174 = arith.constant 0 : index
    %c0_175 = arith.constant 0 : index
    %198 = vector.load %arg2[%c7_173, %c0_174, %c0_175] : memref<9x8x4xf32, #tpu.memory_space<vmem>>, vector<1x8x4xf32>
    %199 = vector.shape_cast %198 : vector<1x8x4xf32> to vector<8x4xf32>
    %c1_176 = arith.constant 1 : index
    %c0_177 = arith.constant 0 : index
    %c144_178 = arith.constant 144 : index
    %200 = vector.load %arg1[%c1_176, %c0_177, %c144_178] : memref<2x4x512xf32, #tpu.memory_space<vmem>>, vector<1x4x256xf32>
    %201 = vector.shape_cast %200 : vector<1x4x256xf32> to vector<4x256xf32>
    %cst_179 = arith.constant dense<0.000000e+00> : vector<8x256xf32>
    %202 = tpu.matmul %199, %201, %cst_179 {dimension_numbers = #tpu.dot_dimension_numbers<[1], [0], [0], [1], [0, 0, 1, 1], [], []>} : vector<8x4xf32>, vector<4x256xf32>, vector<8x256xf32> -> vector<8x256xf32>
    %203 = arith.addf %197, %202 : vector<8x256xf32>
    %204 = arith.addf %186, %203 : vector<8x256xf32>
    %c2_180 = arith.constant 2 : index
    %c0_181 = arith.constant 0 : index
    %c0_182 = arith.constant 0 : index
    %205 = vector.load %arg2[%c2_180, %c0_181, %c0_182] : memref<9x8x4xf32, #tpu.memory_space<vmem>>, vector<1x8x4xf32>
    %206 = vector.shape_cast %205 : vector<1x8x4xf32> to vector<8x4xf32>
    %c1_183 = arith.constant 1 : index
    %c0_184 = arith.constant 0 : index
    %c113_185 = arith.constant 113 : index
    %207 = vector.load %arg1[%c1_183, %c0_184, %c113_185] : memref<2x4x512xf32, #tpu.memory_space<vmem>>, vector<1x4x256xf32>
    %208 = vector.shape_cast %207 : vector<1x4x256xf32> to vector<4x256xf32>
    %cst_186 = arith.constant dense<0.000000e+00> : vector<8x256xf32>
    %209 = tpu.matmul %206, %208, %cst_186 {dimension_numbers = #tpu.dot_dimension_numbers<[1], [0], [0], [1], [0, 0, 1, 1], [], []>} : vector<8x4xf32>, vector<4x256xf32>, vector<8x256xf32> -> vector<8x256xf32>
    %c5_187 = arith.constant 5 : index
    %c0_188 = arith.constant 0 : index
    %c0_189 = arith.constant 0 : index
    %210 = vector.load %arg2[%c5_187, %c0_188, %c0_189] : memref<9x8x4xf32, #tpu.memory_space<vmem>>, vector<1x8x4xf32>
    %211 = vector.shape_cast %210 : vector<1x8x4xf32> to vector<8x4xf32>
    %c1_190 = arith.constant 1 : index
    %c0_191 = arith.constant 0 : index
    %c129_192 = arith.constant 129 : index
    %212 = vector.load %arg1[%c1_190, %c0_191, %c129_192] : memref<2x4x512xf32, #tpu.memory_space<vmem>>, vector<1x4x256xf32>
    %213 = vector.shape_cast %212 : vector<1x4x256xf32> to vector<4x256xf32>
    %cst_193 = arith.constant dense<0.000000e+00> : vector<8x256xf32>
    %214 = tpu.matmul %211, %213, %cst_193 {dimension_numbers = #tpu.dot_dimension_numbers<[1], [0], [0], [1], [0, 0, 1, 1], [], []>} : vector<8x4xf32>, vector<4x256xf32>, vector<8x256xf32> -> vector<8x256xf32>
    %215 = arith.addf %209, %214 : vector<8x256xf32>
    %c8_194 = arith.constant 8 : index
    %c0_195 = arith.constant 0 : index
    %c0_196 = arith.constant 0 : index
    %216 = vector.load %arg2[%c8_194, %c0_195, %c0_196] : memref<9x8x4xf32, #tpu.memory_space<vmem>>, vector<1x8x4xf32>
    %217 = vector.shape_cast %216 : vector<1x8x4xf32> to vector<8x4xf32>
    %c1_197 = arith.constant 1 : index
    %c0_198 = arith.constant 0 : index
    %c145_199 = arith.constant 145 : index
    %218 = vector.load %arg1[%c1_197, %c0_198, %c145_199] : memref<2x4x512xf32, #tpu.memory_space<vmem>>, vector<1x4x256xf32>
    %219 = vector.shape_cast %218 : vector<1x4x256xf32> to vector<4x256xf32>
    %cst_200 = arith.constant dense<0.000000e+00> : vector<8x256xf32>
    %220 = tpu.matmul %217, %219, %cst_200 {dimension_numbers = #tpu.dot_dimension_numbers<[1], [0], [0], [1], [0, 0, 1, 1], [], []>} : vector<8x4xf32>, vector<4x256xf32>, vector<8x256xf32> -> vector<8x256xf32>
    %221 = arith.addf %215, %220 : vector<8x256xf32>
    %cst_201 = arith.constant 0.000000e+00 : f32
    %222 = vector.shape_cast %6 : vector<1x256xi1> to vector<1x256xi1>
    %223 = vector.broadcast %222 : vector<1x256xi1> to vector<8x256xi1>
    %224 = vector.broadcast %cst_201 : f32 to vector<8x256xf32>
    %225 = arith.select %223, %221, %224 : vector<8x256xi1>, vector<8x256xf32>
    %226 = arith.addf %204, %225 : vector<8x256xf32>
    %227 = vector.broadcast %11 : vector<8x1xf32> to vector<8x256xf32>
    %228 = arith.addf %226, %227 : vector<8x256xf32>
    %cst_202 = arith.constant 0.000000e+00 : f32
    %229 = vector.broadcast %cst_202 : f32 to vector<8x256xf32>
    %230 = arith.maximumf %228, %229 : vector<8x256xf32>
    %231 = vector.broadcast %12 : vector<8x1xf32> to vector<8x256xf32>
    %232 = arith.mulf %230, %231 : vector<8x256xf32>
    %233 = vector.broadcast %13 : vector<8x1xf32> to vector<8x256xf32>
    %234 = arith.addf %232, %233 : vector<8x256xf32>
    %c0_203 = arith.constant 0 : index
    %c0_204 = arith.constant 0 : index
    %235 = vector.load %arg3[%c0_203, %c0_204] : memref<8x8xf32, #tpu.memory_space<vmem>>, vector<8x8xf32>
    %cst_205 = arith.constant dense<0.000000e+00> : vector<8x256xf32>
    %236 = tpu.matmul %235, %234, %cst_205 {dimension_numbers = #tpu.dot_dimension_numbers<[1], [0], [0], [1], [0, 0, 1, 1], [], []>} : vector<8x8xf32>, vector<8x256xf32>, vector<8x256xf32> -> vector<8x256xf32>
    %237 = vector.broadcast %14 : vector<8x1xf32> to vector<8x256xf32>
    %238 = arith.addf %236, %237 : vector<8x256xf32>
    %cst_206 = arith.constant 0.000000e+00 : f32
    %239 = vector.broadcast %cst_206 : f32 to vector<8x256xf32>
    %240 = arith.maximumf %238, %239 : vector<8x256xf32>
    %241 = vector.broadcast %15 : vector<8x1xf32> to vector<8x256xf32>
    %242 = arith.mulf %240, %241 : vector<8x256xf32>
    %243 = vector.broadcast %16 : vector<8x1xf32> to vector<8x256xf32>
    %244 = arith.addf %242, %243 : vector<8x256xf32>
    %245 = arith.addf %244, %234 : vector<8x256xf32>
    %c0_207 = arith.constant 0 : index
    %c128_208 = arith.constant 128 : index
    %246 = vector.load %arg7[%c0_207, %c128_208] : memref<8x512xf32, #tpu.memory_space<vmem>>, vector<8x256xf32>
    tpu.vector_store %arg7[%c0_207, %c128_208], %245 {strides = array<i32>} : memref<8x512xf32, #tpu.memory_space<vmem>>, vector<8x256xf32>,
    %c0_209 = arith.constant 0 : index
    %c0_210 = arith.constant 0 : index
    %c0_211 = arith.constant 0 : index
    %247 = vector.load %arg4[%c0_209, %c0_210, %c0_211] : memref<9x8x8xf32, #tpu.memory_space<vmem>>, vector<1x8x8xf32>
    %248 = vector.shape_cast %247 : vector<1x8x8xf32> to vector<8x8xf32>
    %c0_212 = arith.constant 0 : index
    %c111_213 = arith.constant 111 : index
    %249 = vector.load %arg7[%c0_212, %c111_213] : memref<8x512xf32, #tpu.memory_space<vmem>>, vector<8x256xf32>
    %cst_214 = arith.constant dense<0.000000e+00> : vector<8x256xf32>
    %250 = tpu.matmul %248, %249, %cst_214 {dimension_numbers = #tpu.dot_dimension_numbers<[1], [0], [0], [1], [0, 0, 1, 1], [], []>} : vector<8x8xf32>, vector<8x256xf32>, vector<8x256xf32> -> vector<8x256xf32>
    %c3_215 = arith.constant 3 : index
    %c0_216 = arith.constant 0 : index
    %c0_217 = arith.constant 0 : index
    %251 = vector.load %arg4[%c3_215, %c0_216, %c0_217] : memref<9x8x8xf32, #tpu.memory_space<vmem>>, vector<1x8x8xf32>
    %252 = vector.shape_cast %251 : vector<1x8x8xf32> to vector<8x8xf32>
    %c0_218 = arith.constant 0 : index
    %c127_219 = arith.constant 127 : index
    %253 = vector.load %arg7[%c0_218, %c127_219] : memref<8x512xf32, #tpu.memory_space<vmem>>, vector<8x256xf32>
    %cst_220 = arith.constant dense<0.000000e+00> : vector<8x256xf32>
    %254 = tpu.matmul %252, %253, %cst_220 {dimension_numbers = #tpu.dot_dimension_numbers<[1], [0], [0], [1], [0, 0, 1, 1], [], []>} : vector<8x8xf32>, vector<8x256xf32>, vector<8x256xf32> -> vector<8x256xf32>
    %255 = arith.addf %250, %254 : vector<8x256xf32>
    %c6_221 = arith.constant 6 : index
    %c0_222 = arith.constant 0 : index
    %c0_223 = arith.constant 0 : index
    %256 = vector.load %arg4[%c6_221, %c0_222, %c0_223] : memref<9x8x8xf32, #tpu.memory_space<vmem>>, vector<1x8x8xf32>
    %257 = vector.shape_cast %256 : vector<1x8x8xf32> to vector<8x8xf32>
    %c0_224 = arith.constant 0 : index
    %c143_225 = arith.constant 143 : index
    %258 = vector.load %arg7[%c0_224, %c143_225] : memref<8x512xf32, #tpu.memory_space<vmem>>, vector<8x256xf32>
    %cst_226 = arith.constant dense<0.000000e+00> : vector<8x256xf32>
    %259 = tpu.matmul %257, %258, %cst_226 {dimension_numbers = #tpu.dot_dimension_numbers<[1], [0], [0], [1], [0, 0, 1, 1], [], []>} : vector<8x8xf32>, vector<8x256xf32>, vector<8x256xf32> -> vector<8x256xf32>
    %260 = arith.addf %255, %259 : vector<8x256xf32>
    %cst_227 = arith.constant 0.000000e+00 : f32
    %261 = vector.shape_cast %4 : vector<1x256xi1> to vector<1x256xi1>
    %262 = vector.broadcast %261 : vector<1x256xi1> to vector<8x256xi1>
    %263 = vector.broadcast %cst_227 : f32 to vector<8x256xf32>
    %264 = arith.select %262, %260, %263 : vector<8x256xi1>, vector<8x256xf32>
    %c1_228 = arith.constant 1 : index
    %c0_229 = arith.constant 0 : index
    %c0_230 = arith.constant 0 : index
    %265 = vector.load %arg4[%c1_228, %c0_229, %c0_230] : memref<9x8x8xf32, #tpu.memory_space<vmem>>, vector<1x8x8xf32>
    %266 = vector.shape_cast %265 : vector<1x8x8xf32> to vector<8x8xf32>
    %c0_231 = arith.constant 0 : index
    %c112_232 = arith.constant 112 : index
    %267 = vector.load %arg7[%c0_231, %c112_232] : memref<8x512xf32, #tpu.memory_space<vmem>>, vector<8x256xf32>
    %cst_233 = arith.constant dense<0.000000e+00> : vector<8x256xf32>
    %268 = tpu.matmul %266, %267, %cst_233 {dimension_numbers = #tpu.dot_dimension_numbers<[1], [0], [0], [1], [0, 0, 1, 1], [], []>} : vector<8x8xf32>, vector<8x256xf32>, vector<8x256xf32> -> vector<8x256xf32>
    %c4_234 = arith.constant 4 : index
    %c0_235 = arith.constant 0 : index
    %c0_236 = arith.constant 0 : index
    %269 = vector.load %arg4[%c4_234, %c0_235, %c0_236] : memref<9x8x8xf32, #tpu.memory_space<vmem>>, vector<1x8x8xf32>
    %270 = vector.shape_cast %269 : vector<1x8x8xf32> to vector<8x8xf32>
    %c0_237 = arith.constant 0 : index
    %c128_238 = arith.constant 128 : index
    %271 = vector.load %arg7[%c0_237, %c128_238] : memref<8x512xf32, #tpu.memory_space<vmem>>, vector<8x256xf32>
    %cst_239 = arith.constant dense<0.000000e+00> : vector<8x256xf32>
    %272 = tpu.matmul %270, %271, %cst_239 {dimension_numbers = #tpu.dot_dimension_numbers<[1], [0], [0], [1], [0, 0, 1, 1], [], []>} : vector<8x8xf32>, vector<8x256xf32>, vector<8x256xf32> -> vector<8x256xf32>
    %273 = arith.addf %268, %272 : vector<8x256xf32>
    %c7_240 = arith.constant 7 : index
    %c0_241 = arith.constant 0 : index
    %c0_242 = arith.constant 0 : index
    %274 = vector.load %arg4[%c7_240, %c0_241, %c0_242] : memref<9x8x8xf32, #tpu.memory_space<vmem>>, vector<1x8x8xf32>
    %275 = vector.shape_cast %274 : vector<1x8x8xf32> to vector<8x8xf32>
    %c0_243 = arith.constant 0 : index
    %c144_244 = arith.constant 144 : index
    %276 = vector.load %arg7[%c0_243, %c144_244] : memref<8x512xf32, #tpu.memory_space<vmem>>, vector<8x256xf32>
    %cst_245 = arith.constant dense<0.000000e+00> : vector<8x256xf32>
    %277 = tpu.matmul %275, %276, %cst_245 {dimension_numbers = #tpu.dot_dimension_numbers<[1], [0], [0], [1], [0, 0, 1, 1], [], []>} : vector<8x8xf32>, vector<8x256xf32>, vector<8x256xf32> -> vector<8x256xf32>
    %278 = arith.addf %273, %277 : vector<8x256xf32>
    %279 = arith.addf %264, %278 : vector<8x256xf32>
    %c2_246 = arith.constant 2 : index
    %c0_247 = arith.constant 0 : index
    %c0_248 = arith.constant 0 : index
    %280 = vector.load %arg4[%c2_246, %c0_247, %c0_248] : memref<9x8x8xf32, #tpu.memory_space<vmem>>, vector<1x8x8xf32>
    %281 = vector.shape_cast %280 : vector<1x8x8xf32> to vector<8x8xf32>
    %c0_249 = arith.constant 0 : index
    %c113_250 = arith.constant 113 : index
    %282 = vector.load %arg7[%c0_249, %c113_250] : memref<8x512xf32, #tpu.memory_space<vmem>>, vector<8x256xf32>
    %cst_251 = arith.constant dense<0.000000e+00> : vector<8x256xf32>
    %283 = tpu.matmul %281, %282, %cst_251 {dimension_numbers = #tpu.dot_dimension_numbers<[1], [0], [0], [1], [0, 0, 1, 1], [], []>} : vector<8x8xf32>, vector<8x256xf32>, vector<8x256xf32> -> vector<8x256xf32>
    %c5_252 = arith.constant 5 : index
    %c0_253 = arith.constant 0 : index
    %c0_254 = arith.constant 0 : index
    %284 = vector.load %arg4[%c5_252, %c0_253, %c0_254] : memref<9x8x8xf32, #tpu.memory_space<vmem>>, vector<1x8x8xf32>
    %285 = vector.shape_cast %284 : vector<1x8x8xf32> to vector<8x8xf32>
    %c0_255 = arith.constant 0 : index
    %c129_256 = arith.constant 129 : index
    %286 = vector.load %arg7[%c0_255, %c129_256] : memref<8x512xf32, #tpu.memory_space<vmem>>, vector<8x256xf32>
    %cst_257 = arith.constant dense<0.000000e+00> : vector<8x256xf32>
    %287 = tpu.matmul %285, %286, %cst_257 {dimension_numbers = #tpu.dot_dimension_numbers<[1], [0], [0], [1], [0, 0, 1, 1], [], []>} : vector<8x8xf32>, vector<8x256xf32>, vector<8x256xf32> -> vector<8x256xf32>
    %288 = arith.addf %283, %287 : vector<8x256xf32>
    %c8_258 = arith.constant 8 : index
    %c0_259 = arith.constant 0 : index
    %c0_260 = arith.constant 0 : index
    %289 = vector.load %arg4[%c8_258, %c0_259, %c0_260] : memref<9x8x8xf32, #tpu.memory_space<vmem>>, vector<1x8x8xf32>
    %290 = vector.shape_cast %289 : vector<1x8x8xf32> to vector<8x8xf32>
    %c0_261 = arith.constant 0 : index
    %c145_262 = arith.constant 145 : index
    %291 = vector.load %arg7[%c0_261, %c145_262] : memref<8x512xf32, #tpu.memory_space<vmem>>, vector<8x256xf32>
    %cst_263 = arith.constant dense<0.000000e+00> : vector<8x256xf32>
    %292 = tpu.matmul %290, %291, %cst_263 {dimension_numbers = #tpu.dot_dimension_numbers<[1], [0], [0], [1], [0, 0, 1, 1], [], []>} : vector<8x8xf32>, vector<8x256xf32>, vector<8x256xf32> -> vector<8x256xf32>
    %293 = arith.addf %288, %292 : vector<8x256xf32>
    %cst_264 = arith.constant 0.000000e+00 : f32
    %294 = vector.shape_cast %6 : vector<1x256xi1> to vector<1x256xi1>
    %295 = vector.broadcast %294 : vector<1x256xi1> to vector<8x256xi1>
    %296 = vector.broadcast %cst_264 : f32 to vector<8x256xf32>
    %297 = arith.select %295, %293, %296 : vector<8x256xi1>, vector<8x256xf32>
    %298 = arith.addf %279, %297 : vector<8x256xf32>
    %299 = vector.broadcast %17 : vector<8x1xf32> to vector<8x256xf32>
    %300 = arith.addf %298, %299 : vector<8x256xf32>
    %cst_265 = arith.constant 0.000000e+00 : f32
    %301 = vector.broadcast %cst_265 : f32 to vector<8x256xf32>
    %302 = arith.maximumf %300, %301 : vector<8x256xf32>
    %303 = vector.broadcast %18 : vector<8x1xf32> to vector<8x256xf32>
    %304 = arith.mulf %302, %303 : vector<8x256xf32>
    %305 = vector.broadcast %19 : vector<8x1xf32> to vector<8x256xf32>
    %306 = arith.addf %304, %305 : vector<8x256xf32>
    %307 = arith.addf %306, %234 : vector<8x256xf32>
    %308 = arith.addf %307, %245 : vector<8x256xf32>
    %c1_266 = arith.constant 1 : index
    %c0_267 = arith.constant 0 : index
    %c0_268 = arith.constant 0 : index
    %309 = vector.load %arg6[%c1_266, %c0_267, %c0_268] : memref<2x8x256xf32, #tpu.memory_space<vmem>>, vector<1x8x256xf32>
    %310 = vector.shape_cast %309 : vector<1x8x256xf32> to vector<8x256xf32>
    %311 = vector.shape_cast %308 : vector<8x256xf32> to vector<1x8x256xf32>
    tpu.vector_store %arg6[%c1_266, %c0_267, %c0_268], %311 {strides = array<i32>} : memref<2x8x256xf32, #tpu.memory_space<vmem>>, vector<1x8x256xf32>,
    return
  }
  func.func @transform_0(%arg0: i32) -> (i32, i32, i32) {
    %c0_i32 = arith.constant 0 : i32
    %c0_i32_0 = arith.constant 0 : i32
    %c0_i32_1 = arith.constant 0 : i32
    return %arg0, %c0_i32, %c0_i32_0 : i32, i32, i32
  }
  func.func @transform_1(%arg0: i32) -> (i32, i32, i32) {
    %c0_i32 = arith.constant 0 : i32
    %c0_i32_0 = arith.constant 0 : i32
    %c0_i32_1 = arith.constant 0 : i32
    %c0_i32_2 = arith.constant 0 : i32
    return %c0_i32, %c0_i32_0, %c0_i32_1 : i32, i32, i32
  }
  func.func @transform_2(%arg0: i32) -> (i32, i32) {
    %c0_i32 = arith.constant 0 : i32
    %c0_i32_0 = arith.constant 0 : i32
    %c0_i32_1 = arith.constant 0 : i32
    return %c0_i32, %c0_i32_0 : i32, i32
  }
  func.func @transform_3(%arg0: i32) -> (i32, i32, i32) {
    %c0_i32 = arith.constant 0 : i32
    %c0_i32_0 = arith.constant 0 : i32
    %c0_i32_1 = arith.constant 0 : i32
    %c0_i32_2 = arith.constant 0 : i32
    return %c0_i32, %c0_i32_0, %c0_i32_1 : i32, i32, i32
  }
  func.func @transform_4(%arg0: i32) -> (i32, i32) {
    %c0_i32 = arith.constant 0 : i32
    %c0_i32_0 = arith.constant 0 : i32
    %c0_i32_1 = arith.constant 0 : i32
    return %c0_i32, %c0_i32_0 : i32, i32
  }
  func.func @transform_5(%arg0: i32) -> (i32, i32, i32) {
    %c0_i32 = arith.constant 0 : i32
    %c0_i32_0 = arith.constant 0 : i32
    %c0_i32_1 = arith.constant 0 : i32
    return %arg0, %c0_i32, %c0_i32_0 : i32, i32, i32
  }
}

</mosaic_0001>

<bundles_post_ra>
// kernel: tpu_custom_call.1
= control target key start
LH: loop header
LB: loop body
LE: loop exit
PB: predicated region body
PF: predicated region fallthrough
CT: control target
= control target key end

     0   :  { %s3780_s20 = smov 1   ;;  %s3781_s23 = smov 17   ;;  %v3782_v3 = vmov 0.0   ;;  %s4555_s0 = inlined_call_operand.vmem [shape: f32[2,4,512], index: 0, kind: input, shape index: {}]   ;;  %s4556_s1 = inlined_call_operand.vmem [shape: f32[9,8,4], index: 1, kind: input, shape index: {}]   ;;  %s4557_s2 = inlined_call_operand.vmem [shape: f32[8,8], index: 2, kind: input, shape index: {}]   ;;  %s4558_s3 = inlined_call_operand.vmem [shape: f32[9,8,8], index: 3, kind: input, shape index: {}]   ;;  %s4559_s4 = inlined_call_operand.vmem [shape: f32[8,9], index: 4, kind: input, shape index: {}]   ;;  %s4560_s5 = inlined_call_operand.hbm [shape: f32[2,8,256], index: 5, kind: output, shape index: {}]  }
   0x1   :  { %v34_v0 = vld [vmem:[%s4555_s0] sm:$0xff]  ;;  %v35_v2 = vld [vmem:[%s4555_s0 + $0x8] sm:$0xf]  ;;  %123 = vmatprep.mubr.f32.mxu0 %v3782_v3 }
   0x2   :  { %41 = vrot.lane.b32.xlu1 %v34_v0, %s3780_s20  ;;  %v40_v1 = vcombine.high %v34_v0, %v34_v0 }
   0x4   :  { %43 = vrot.lane.b32.xlu0 %v40_v1, %s3780_s20 }
   0x6   :  { %132 = vrot.lane.b32.xlu1 %v40_v1, %s3781_s23 }
   0x7   :  { %10 = vsyncpa [#allocation4], 0  ;;  %489 = vmatprep.mubr.f32.mxu1 %v3782_v3  ;;  %v3845_v4 = vld [vmem:[%s4555_s0 + $0x4] sm:$0xff]  ;;  %v220_v5 = vld [vmem:[%s4555_s0 + $0xc] sm:$0xf]  ;;  %s3783_s28 = smov 113  }
   0x8   :  { %45 = vrot.lane.b32.xlu0 %v35_v2, %s3780_s20  ;;  %v3854_v6 = vcombine.high %v3845_v4, %v3845_v4  ;;  %s3784_s29 = smov 127   ;;  %v601_v7 = vld [vmem:[%s4555_s0 + $0xc] sm:$0xf]  ;;  %v322_v8 = vld [vmem:[%s4555_s0 + $0x8] sm:$0xf]  ;;  %s3785_s9 = smov 16  }
   0x9   :  { %s3786_s10 = smov 15   ;;  %v597_v9 = vld [vmem:[%s4555_s0 + $0x8] sm:$0xf]  ;;  %v499_v10 = vld [vmem:[%s4555_s0 + $0xc] sm:$0xf]  ;;  %s3787_s15 = smov 112  }
   0xa   :  { %130 = vrot.lane.b32.xlu1 %v34_v0, %s3781_s23  ;;  %v3788_v11 = vmov 0   ;;  %v3789_v12 = vmov 1   ;;  %s3790_s16 = smov 111   ;;  %v785_v13 = vld [vmem:[%s4555_s0 + $0xc] sm:$0xf]  ;;  %v3899_v14 = vld [vmem:[%s4559_s4] sm:$0xff] }
   0xb   :  { %3742 = vset.pattern.permute.xlu0 %v3788_v11  ;;  %3743 = vset.pattern.permute.xlu1 %v3789_v12  ;;  %v3791_v15 = vmov 2   ;;  %vm47_vm0 = vcmask 7168   ;;  %vm54_vm1 = vcmask 1043456   ;;  %v3909_v21 = vld [vmem:[%s4556_s1 + $0x18] sm:$0xff]  ;;  %vm50_vm2 = vcmask 31744   ;;  %v3925_v30 = vld [vmem:[%s4556_s1] sm:$0xff] }
   0xc   :  { %134 = vrot.lane.b32.xlu0 %v35_v2, %s3781_s23  ;;  %vm136_vm3 = vcmask 138240   ;;  %vm230_vm4 = vcmask 924672   ;;  %v3938_v36 = vld [vmem:[%s4556_s1 + $0x30] sm:$0xff]  ;;  %vm415_vm5 = vcmask 130048   ;;  %vm611_vm6 = vcmask 1039360   ;;  %v3950_v41 = vld [vmem:[%s4556_s1 + $0x20] sm:$0xff] }
   0xd   :  { %v3960_v45 = vld [vmem:[%s4556_s1 + $0x8] sm:$0xff]  ;;  %vm701_vm7 = vcmask 121856   ;;  %vm509_vm8 = vcmask 916480   ;;  %v3985_v55 = vld [vmem:[%s4556_s1 + $0x10] sm:$0xff]  ;;  %v3993_v58 = vld [vmem:[%s4556_s1 + $0x38] sm:$0xff]  ;;  %vm795_vm9 = vcmask 908288  }
   0xe   :  { %228 = vrot.lane.b32.xlu1 %v220_v5, %s3783_s28  ;;  %v3968_v47 = vld [vmem:[%s4556_s1 + $0x28] sm:$0xff]  ;;  %v4005_v63 = vld [vmem:[%s4556_s1 + $0x40] sm:$0xff]  ;;  %v3793_v2 = vmov 4   ;;  %v4029_v5 = vld [vmem:[%s4555_s0 + $0x10] sm:$0xff]  ;;  %vm912_vm14 = vcmask 64512  }
  0x10   :  { %226 = vrot.lane.b32.xlu0 %v3854_v6, %s3783_s28 }
  0x12   :  { %607 = vrot.lane.b32.xlu1 %v3854_v6, %s3784_s29 }
  0x14   :  { %224 = vrot.lane.b32.xlu0 %v3845_v4, %s3783_s28 }
  0x16   :  { %605 = vrot.lane.b32.xlu1 %v3845_v4, %s3784_s29 }
  0x18   :  { %609 = vrot.lane.b32.xlu0 %v601_v7, %s3784_s29 }
  0x1a   :  { %413 = vrot.lane.b32.xlu1 %v322_v8, %s3785_s9 }
  0x1c   :  { %411 = vrot.lane.b32.xlu0 %v40_v1, %s3785_s9 }
  0x1e   :  { %697 = vrot.lane.b32.xlu1 %v40_v1, %s3786_s10  ;;  %v3792_v1 = vmov 3  }
  0x20   :  { %409 = vrot.lane.b32.xlu0 %v34_v0, %s3785_s9 }
  0x22   :  { %695 = vrot.lane.b32.xlu1 %v34_v0, %s3786_s10 }
  0x24   :  { %699 = vrot.lane.b32.xlu0 %v597_v9, %s3786_s10  ;;  %v21_v9 = vlaneseq }
  0x26   :  { %507 = vrot.lane.b32.xlu1 %v499_v10, %s3787_s15  ;;  %v22_v12 = vand.u32 127, %v21_v9 }
  0x28   :  { %505 = vrot.lane.b32.xlu0 %v3854_v6, %s3787_s15 }
  0x2a   :  { %791 = vrot.lane.b32.xlu1 %v3854_v6, %s3790_s16 }
  0x2c   :  { %503 = vrot.lane.b32.xlu0 %v3845_v4, %s3787_s15 }
  0x2e   :  { %789 = vrot.lane.b32.xlu1 %v3845_v4, %s3790_s16 }
  0x30   :  { %793 = vrot.lane.b32.xlu0 %v785_v13, %s3790_s16  ;;  %v23_v13 = vadd.s32 128, %v22_v12 }
  0x32   :  { %896 = vperm.xlu1 %3743, %v3899_v14  }
  0x34   :  { %888 = vperm.xlu0 %3742, %v3899_v14  }
  0x36   :  { %3744 = vset.pattern.permute.xlu1 %v3791_v15  ;;  %v24_v15 = vand.u32 15, %v22_v12  ;;  %v4153_v12 = vld [vmem:[%s4555_s0 + $0x14] sm:$0xff] }
  0x37   :  { %902 = vperm.xlu1 %3744, %v3899_v14  }
  0x38   :  { %3745 = vset.pattern.permute.xlu0 %v3792_v1  ;;  %vm4043_vm10 = vcmp.ge.s32.totalorder %v24_v15, 1  ;;  %vm4055_vm12 = vcmp.lt.s32.totalorder %v24_v15, 15  ;;  %v3617_v15 = vld [vmem:[%s4555_s0 + $0x1c] sm:$0xf] }
  0x39   :  { %909 = vperm.xlu0 %3745, %v3899_v14  }
  0x3b   :  { %3746 = vset.pattern.permute.xlu1 %v3793_v2 }
  0x3c   :  { %990 = vperm.xlu1 %3746, %v3899_v14  }
  0x3d   :  { %1014 = vrot.lane.b32.xlu0 %v3782_v3, %s3780_s20 }
  0x41   :  { %1356 = vrot.lane.b32.xlu0 %v3782_v3, %s3785_s9 }
  0x45   :  { %1194 = vrot.lane.b32.xlu0 %v3782_v3, %s3783_s28 }
  0x49   :  { %1538 = vrot.lane.b32.xlu0 %v3782_v3, %s3784_s29 }
  0x74   :  { %v42_v16 = vpop.permute.xlu1 %41 }
  0x76   :  { %v44_v17 = vpop.permute.xlu0 %43 }
  0x77   :  { %v48_v23 = vsel %vm47_vm0, %v42_v16, %v44_v17  ;;  %v25_v16 = vand.u32 15, %v23_v13  ;;  %v4161_v13 = vcombine.high %v4153_v12, %v4153_v12 }
  0x78   :  { %v133_v18 = vpop.permute.xlu1 %132 }
  0x79   :  { %vm4047_vm11 = vcmp.ge.s32.totalorder %v25_v16, 1  ;;  %vm4059_vm13 = vcmp.lt.s32.totalorder %v25_v16, 15  ;;  %v3643_v16 = vld [vmem:[%s4555_s0 + $0x1c] sm:$0xf] }
  0x7a   :  { %v46_v19 = vpop.permute.xlu0 %45 }
  0x7b   :  { %v49_v20 = vsel %vm47_vm0, %v44_v17, %v46_v19 }
  0x7c   :  { %v131_v22 = vpop.permute.xlu1 %130  ;;  %3554 = vmatprep.subr.msk.mxu0 %vm54_vm1, %v49_v20 }
  0x7d   :  { %3555 = vmatpush1.msk.msra.mxu0 %vm54_vm1, %v48_v23  ;;  %v137_v26 = vsel %vm136_vm3, %v131_v22, %v133_v18 }
  0x7e   :  { %3556 = vmatmul.mubr.msk.f32.vlgmr.msra.gmra.mrb[0].mxu0 %vm50_vm2, %v3909_v21  ;;  %v135_v24 = vpop.permute.xlu0 %134 }
  0x7f   :  { %v138_v25 = vsel %vm136_vm3, %v133_v18, %v135_v24  ;;  %210 = vmatprep.mubr.f32.mxu0 %v3782_v3 }
  0x80   :  { %v229_v27 = vpop.permute.xlu1 %228  ;;  %3557 = vmatprep.subr.msk.mxu0 %vm54_vm1, %v138_v25 }
  0x81   :  { %3558 = vmatpush1.msk.msra.mxu0 %vm54_vm1, %v137_v26 }
  0x82   :  { %v227_v28 = vpop.permute.xlu0 %226 }
  0x83   :  { %v232_v29 = vsel %vm230_vm4, %v227_v28, %v229_v27 }
  0x84   :  { %v608_v31 = vpop.permute.xlu1 %607  ;;  %3561 = vmatprep.subr.msk.mxu0 %vm54_vm1, %v232_v29 }
  0x86   :  { %v225_v32 = vpop.permute.xlu0 %224  ;;  %3559 = vmatmul.mubr.msk.f32.vlgmr.msra.gmra.mrb[0].mxu0 %vm50_vm2, %v3925_v30 }
  0x87   :  { %v231_v33 = vsel %vm230_vm4, %v225_v32, %v227_v28  ;;  %304 = vmatprep.mubr.f32.mxu0 %v3782_v3 }
  0x88   :  { %v606_v34 = vpop.permute.xlu1 %605  ;;  %3562 = vmatpush1.msk.msra.mxu0 %vm54_vm1, %v231_v33 }
  0x89   :  { %3566 = vmatprep.subr.msk.mxu0 %vm54_vm1, %v3854_v6  ;;  %v612_v43 = vsel %vm611_vm6, %v606_v34, %v608_v31  ;;  %v4035_v6 = vcombine.high %v4029_v5, %v4029_v5 }
  0x8a   :  { %v610_v35 = vpop.permute.xlu0 %609 }
  0x8b   :  { %v613_v39 = vsel %vm611_vm6, %v608_v31, %v610_v35  ;;  %1830 = vrot.lane.b32.xlu0 %v4035_v6, %s3780_s20 }
  0x8c   :  { %v414_v37 = vpop.permute.xlu1 %413 }
  0x8e   :  { %v412_v38 = vpop.permute.xlu0 %411  ;;  %3563 = vmatmul.mubr.msk.f32.vlgmr.msra.gmra.mrb[0].mxu0 %vm50_vm2, %v3938_v36 }
  0x8f   :  { %3567 = vmatpush1.msk.msra.mxu0 %vm54_vm1, %v3845_v4  ;;  %v417_v40 = vsel %vm415_vm5, %v412_v38, %v414_v37  ;;  %399 = vmatprep.mubr.f32.mxu0 %v3782_v3  ;;  %v3794_v4 = vmov 5  }
  0x90   :  { %3578 = vmatprep.subr.msk.mxu0 %vm54_vm1, %v613_v39  ;;  %v698_v42 = vpop.permute.xlu1 %697  ;;  %3569 = vmatprep.subr.msk.mxu1 %vm54_vm1, %v417_v40 }
  0x91   :  { %3747 = vset.pattern.permute.xlu1 %v3794_v4  ;;  %1828 = vrot.lane.b32.xlu0 %v4029_v5, %s3780_s20 }
  0x92   :  { %v410_v44 = vpop.permute.xlu0 %409  ;;  %3568 = vmatmul.mubr.msk.f32.vlgmr.msra.gmra.mrb[2].mxu0 %vm50_vm2, %v3950_v41  ;;  %996 = vperm.xlu1 %3747, %v3899_v14  }
  0x93   :  { %3579 = vmatpush1.msk.msra.mxu0 %vm54_vm1, %v612_v43  ;;  %v416_v46 = vsel %vm415_vm5, %v410_v44, %v412_v38  ;;  %685 = vmatprep.mubr.f32.mxu0 %v3782_v3 }
  0x94   :  { %v696_v48 = vpop.permute.xlu1 %695  ;;  %3570 = vmatpush1.msk.msra.mxu1 %vm54_vm1, %v416_v46 }
  0x95   :  { %3571 = vmatmul.mubr.msk.f32.vlgmr.msra.gmra.mrb[0].mxu1 %vm50_vm2, %v3960_v45  ;;  %v702_v51 = vsel %vm701_vm7, %v696_v48, %v698_v42  ;;  %1916 = vrot.lane.b32.xlu0 %v4035_v6, %s3781_s23 }
  0x96   :  { %v700_v49 = vpop.permute.xlu0 %699  ;;  %3580 = vmatmul.mubr.msk.f32.vlgmr.msra.gmra.mrb[4].mxu0 %vm50_vm2, %v3968_v47  ;;  %583 = vmatprep.mubr.f32.mxu1 %v3782_v3 }
  0x97   :  { %v703_v50 = vsel %vm701_vm7, %v698_v42, %v700_v49  ;;  %775 = vmatprep.mubr.f32.mxu0 %v3782_v3  ;;  %1098 = vrot.lane.b32.xlu1 %v3782_v3, %s3781_s23 }
  0x98   :  { %v508_v52 = vpop.permute.xlu1 %507  ;;  %3581 = vmatprep.subr.msk.mxu0 %vm54_vm1, %v703_v50 }
  0x99   :  { %3582 = vmatpush1.msk.msra.mxu0 %vm54_vm1, %v702_v51 }
  0x9a   :  { %v506_v53 = vpop.permute.xlu0 %505 }
  0x9b   :  { %v511_v54 = vsel %vm509_vm8, %v506_v53, %v508_v52  ;;  %1446 = vrot.lane.b32.xlu1 %v3782_v3, %s3787_s15  ;;  %v4086_v52 = vld [vmem:[%s4557_s2] sm:$0xff] }
  0x9c   :  { %v792_v56 = vpop.permute.xlu1 %791  ;;  %3573 = vmatprep.subr.msk.mxu1 %vm54_vm1, %v511_v54 }
  0x9e   :  { %v504_v57 = vpop.permute.xlu0 %503  ;;  %3583 = vmatmul.mubr.msk.f32.vlgmr.msra.gmra.mrb[4].mxu0 %vm50_vm2, %v3985_v55 }
  0x9f   :  { %v510_v59 = vsel %vm509_vm8, %v504_v57, %v506_v53  ;;  %869 = vmatprep.mubr.f32.mxu0 %v3782_v3  ;;  %v3607_v53 = vld [vmem:[%s4555_s0 + $0x18] sm:$0xf] }
  0xa0   :  { %3574 = vmatpush1.msk.msra.mxu1 %vm54_vm1, %v510_v59  ;;  %v790_v60 = vpop.permute.xlu1 %789  ;;  %1832 = vrot.lane.b32.xlu1 %v3607_v53, %s3780_s20 }
  0xa1   :  { %3575 = vmatmul.mubr.msk.f32.vlgmr.msra.gmra.mrb[0].mxu1 %vm50_vm2, %v3993_v58  ;;  %v796_v0 = vsel %vm795_vm9, %v790_v60, %v792_v56 }
  0xa2   :  { %v794_v61 = vpop.permute.xlu0 %793  ;;  %980 = vmatprep.mubr.f32.mxu1 %v3782_v3 }
  0xa3   :  { %v797_v62 = vsel %vm795_vm9, %v792_v56, %v794_v61 }
  0xa4   :  { %3585 = vmatprep.subr.msk.mxu0 %vm54_vm1, %v797_v62  ;;  %1618 = vrot.lane.b32.xlu1 %v3782_v3, %s3786_s10 }
  0xa5   :  { %3586 = vmatpush1.msk.msra.mxu0 %vm54_vm1, %v796_v0 }
  0xa6   :  { %3587 = vmatmul.mubr.msk.f32.vlgmr.msra.gmra.mrb[4].mxu0 %vm50_vm2, %v4005_v63 }
  0xa7   :  { %1349 = vmatprep.mubr.f32.mxu0 %v3782_v3 }
  0xb1   :  { %v4069_v38 = vpop.permute.xlu1 %896 }
  0xb3   :  { %v4065_v34 = vpop.permute.xlu0 %888 }
  0xb6   :  { %v4074_v48 = vpop.permute.xlu1 %902 }
  0xb8   :  { %v4099_v54 = vpop.permute.xlu0 %909 }
  0xbb   :  { %v4101_v56 = vpop.permute.xlu1 %990 }
 0x111   :  { %v4105_v1 = vpop.permute.xlu1 %996 }
 0x161   :  { %v306_v7 = vpop.f32.mrb[0].mxu0 }
 0x162   :  { %v308_v8 = vpop.f32.mrb[1].mxu0  ;;  %v317_v23 = vsel %vm4043_vm10, %v306_v7, 0.0 }
 0x163   :  { %v318_v25 = vsel %vm4047_vm11, %v308_v8, 0.0 }
 0x165   :  { %v401_v10 = vpop.f32.mrb[2].mxu0 }
 0x166   :  { %v403_v11 = vpop.f32.mrb[3].mxu0 }
 0x174   :  { %v585_v19 = vpop.f32.mrb[0].mxu1 }
 0x175   :  { %v3674_v20 = vadd.f32 %v585_v19, %v401_v10  ;;  %v587_v22 = vpop.f32.mrb[1].mxu1  ;;  %v3640_v19 = vld [vmem:[%s4555_s0 + $0x18] sm:$0xf] }
 0x176   :  { %v3675_v24 = vadd.f32 %v587_v22, %v403_v11  ;;  %v4130_v11 = vld [vmem:[%s4558_s3 + $0x20] sm:$0xff]  ;;  %v3652_v22 = vld [vmem:[%s4555_s0 + $0x1c] sm:$0xf] }
 0x177   :  { %v592_v26 = vadd.f32 %v3674_v20, %v317_v23  ;;  %v3623_v20 = vld [vmem:[%s4555_s0 + $0x18] sm:$0xf]  ;;  %v3634_v23 = vld [vmem:[%s4555_s0 + $0x1c] sm:$0xf] }
 0x178   :  { %v593_v28 = vadd.f32 %v3675_v24, %v318_v25  ;;  %v1099_v25 = vpop.permute.xlu1 %1098 }
 0x179   :  { %v871_v31 = vpop.f32.mrb[4].mxu0 }
 0x17a   :  { %v882_v32 = vsel %vm4055_vm12, %v871_v31, 0.0  ;;  %v873_v33 = vpop.f32.mrb[5].mxu0 }
 0x17b   :  { %v884_v35 = vadd.f32 %v882_v32, %v592_v26  ;;  %v883_v37 = vsel %vm4059_vm13, %v873_v33, 0.0 }
 0x17c   :  { %v885_v39 = vadd.f32 %v883_v37, %v593_v28  ;;  %v1447_v28 = vpop.permute.xlu1 %1446 }
 0x17d   :  { %v891_v40 = vadd.f32 %v4065_v34, %v884_v35 }
 0x17e   :  { %v892_v42 = vadd.f32 %v4065_v34, %v885_v39 }
 0x17f   :  { %v893_v43 = vmax.f32 %v891_v40, 0.0 }
 0x180   :  { %v894_v44 = vmax.f32 %v892_v42, 0.0  ;;  %v1833_v32 = vpop.permute.xlu1 %1832 }
 0x181   :  { %v899_v46 = vmul.f32 %v4069_v38, %v893_v43 }
 0x182   :  { %v900_v49 = vmul.f32 %v4069_v38, %v894_v44 }
 0x183   :  { %v4081_v51 = vadd.f32 %v4074_v48, %v899_v46 }
 0x184   :  { %v4078_v50 = vadd.f32 %v4074_v48, %v900_v49  ;;  %v4225_v35 = vpop.permute.xlu1 %1618 }
 0x186   :  { %916 = vmatprep.subr.mxu1 %v4078_v50 }
 0x187   :  { %917 = vmatpush1.msra.mxu1 %v4081_v51 }
 0x188   :  { %3588 = vmatmul.mubr.msk.f32.vlgmr.msra.gmra.mrb[2].mxu1 %vm912_vm14, %v4086_v52 }
 0x189   :  { %1091 = vmatprep.mubr.f32.mxu1 %v3782_v3 }
 0x25b   :  { %v982_v57 = vpop.f32.mrb[2].mxu1 }
 0x25c   :  { %v983_v59 = vadd.f32 %v982_v57, %v4099_v54  ;;  %v984_v60 = vpop.f32.mrb[3].mxu1 }
 0x25d   :  { %v985_v61 = vadd.f32 %v984_v60, %v4099_v54 }
 0x25e   :  { %v987_v62 = vmax.f32 %v983_v59, 0.0 }
 0x25f   :  { %v988_v0 = vmax.f32 %v985_v61, 0.0  ;;  %v4235_v61 = vld [vmem:[%s4558_s3 + $0x18] sm:$0xff] }
 0x260   :  { %v993_v2 = vmul.f32 %v4101_v56, %v987_v62 }
 0x261   :  { %v994_v4 = vmul.f32 %v4101_v56, %v988_v0 }
 0x262   :  { %v999_v7 = vadd.f32 %v4105_v1, %v993_v2 }
 0x263   :  { %v1000_v8 = vadd.f32 %v4105_v1, %v994_v4 }
 0x264   :  { %v4112_v9 = vadd.f32 %v999_v7, %v4081_v51 }
 0x265   :  { %v4115_v10 = vadd.f32 %v1000_v8, %v4078_v50 }
 0x266   :  { %1100 = vrot.lane.b32.xlu1 %v4112_v9, %s3781_s23  ;;  %1016 = vrot.lane.b32.xlu0 %v4112_v9, %s3780_s20 }
 0x267   :  { %1285 = vmatprep.subr.mxu0 %v4115_v10 }
 0x268   :  { %1286 = vmatpush1.msra.mxu0 %v4112_v9 }
 0x269   :  { %3596 = vmatmul.mubr.msk.f32.vlgmr.msra.gmra.mrb[6].mxu0 %vm912_vm14, %v4130_v11 }
 0x26a   :  { %1190 = vrot.lane.b32.xlu1 %v4112_v9, %s3783_s28  ;;  %1358 = vrot.lane.b32.xlu0 %v4112_v9, %s3785_s9 }
 0x26b   :  { %1433 = vmatprep.mubr.f32.mxu0 %v3782_v3 }
 0x26e   :  { %1534 = vrot.lane.b32.xlu1 %v4112_v9, %s3784_s29  ;;  %1442 = vrot.lane.b32.xlu0 %v4112_v9, %s3787_s15 }
 0x272   :  { %1620 = vrot.lane.b32.xlu1 %v4112_v9, %s3786_s10  ;;  %1102 = vrot.lane.b32.xlu0 %v4115_v10, %s3781_s23 }
 0x276   :  { %1018 = vrot.lane.b32.xlu1 %v4115_v10, %s3780_s20  ;;  %1914 = vrot.lane.b32.xlu0 %v4029_v5, %s3781_s23 }
 0x27a   :  { %1918 = vrot.lane.b32.xlu1 %v3607_v53, %s3781_s23  ;;  %1708 = vrot.lane.b32.xlu0 %v3782_v3, %s3790_s16 }
 0x27e   :  { %1360 = vrot.lane.b32.xlu1 %v4115_v10, %s3785_s9  ;;  %1444 = vrot.lane.b32.xlu0 %v4115_v10, %s3787_s15 }
 0x282   :  { %1704 = vrot.lane.b32.xlu1 %v4112_v9, %s3790_s16  ;;  %2008 = vrot.lane.b32.xlu0 %v4161_v13, %s3783_s28 }
 0x286   :  { %1192 = vrot.lane.b32.xlu1 %v4115_v10, %s3783_s28  ;;  %1622 = vrot.lane.b32.xlu0 %v4115_v10, %s3786_s10 }
 0x28a   :  { %1536 = vrot.lane.b32.xlu1 %v4115_v10, %s3784_s29  ;;  %2006 = vrot.lane.b32.xlu0 %v4153_v12, %s3783_s28 }
 0x28e   :  { %2010 = vrot.lane.b32.xlu1 %v3617_v15, %s3783_s28  ;;  %2379 = vrot.lane.b32.xlu0 %v3643_v16, %s3784_s29 }
 0x292   :  { %2377 = vrot.lane.b32.xlu1 %v4161_v13, %s3784_s29  ;;  %2186 = vrot.lane.b32.xlu0 %v4035_v6, %s3785_s9 }
 0x296   :  { %2375 = vrot.lane.b32.xlu1 %v4153_v12, %s3784_s29  ;;  %2184 = vrot.lane.b32.xlu0 %v4029_v5, %s3785_s9 }
 0x29a   :  { %1706 = vrot.lane.b32.xlu1 %v4115_v10, %s3790_s16  ;;  %2468 = vrot.lane.b32.xlu0 %v3640_v19, %s3786_s10  ;;  %v4249_v19 = vld [vmem:[%s4558_s3] sm:$0xff] }
 0x29e   :  { %2188 = vrot.lane.b32.xlu1 %v3623_v20, %s3785_s9  ;;  %2278 = vrot.lane.b32.xlu0 %v4161_v13, %s3787_s15  ;;  %v4254_v20 = vld [vmem:[%s4558_s3 + $0x8] sm:$0xff] }
 0x2a2   :  { %2466 = vrot.lane.b32.xlu1 %v4035_v6, %s3786_s10  ;;  %2276 = vrot.lane.b32.xlu0 %v4153_v12, %s3787_s15  ;;  %v1015_v6 = vpop.permute.xlu0 %1014 }
 0x2a6   :  { %2464 = vrot.lane.b32.xlu1 %v4029_v5, %s3786_s10  ;;  %2560 = vrot.lane.b32.xlu0 %v3652_v22, %s3790_s16  ;;  %v1357_v24 = vpop.permute.xlu0 %1356 }
 0x2aa   :  { %2280 = vrot.lane.b32.xlu1 %v3634_v23, %s3787_s15  ;;  %2749 = vrot.lane.b32.xlu0 %v3782_v3, %s3780_s20  ;;  %v1195_v5 = vpop.permute.xlu0 %1194 }
 0x2ae   :  { %2558 = vrot.lane.b32.xlu1 %v4161_v13, %s3790_s16  ;;  %v4223_v26 = vpop.permute.xlu0 %1538 }
 0x2b2   :  { %2556 = vrot.lane.b32.xlu1 %v4153_v12, %s3790_s16  ;;  %v1831_v31 = vpop.permute.xlu0 %1830 }
 0x2b6   :  { %v1829_v33 = vpop.permute.xlu0 %1828 }
 0x2ba   :  { %v4227_v37 = vpop.permute.xlu0 %1916 }
 0x2d8   :  { %v1101_v39 = vpop.permute.xlu1 %1100  ;;  %v1017_v40 = vpop.permute.xlu0 %1016 }
 0x2d9   :  { %v1020_v62 = vsel %vm47_vm0, %v1015_v6, %v1017_v40  ;;  %v1104_v2 = vsel %vm136_vm3, %v1099_v25, %v1101_v39 }
 0x2dc   :  { %v1191_v42 = vpop.permute.xlu1 %1190  ;;  %v1359_v43 = vpop.permute.xlu0 %1358 }
 0x2dd   :  { %v1362_v22 = vsel %vm415_vm5, %v1357_v24, %v1359_v43  ;;  %v1835_v24 = vsel %vm47_vm0, %v1831_v31, %v1833_v32  ;;  %v4279_v32 = vld [vmem:[%s4558_s3 + $0x38] sm:$0xff] }
 0x2e0   :  { %v1535_v44 = vpop.permute.xlu1 %1534  ;;  %v1443_v46 = vpop.permute.xlu0 %1442 }
 0x2e4   :  { %v1621_v49 = vpop.permute.xlu1 %1620  ;;  %v1103_v53 = vpop.permute.xlu0 %1102 }
 0x2e5   :  { %v1105_v0 = vsel %vm136_vm3, %v1101_v39, %v1103_v53 }
 0x2e8   :  { %v1019_v57 = vpop.permute.xlu1 %1018  ;;  %v4229_v59 = vpop.permute.xlu0 %1914 }
 0x2e9   :  { %v1021_v60 = vsel %vm47_vm0, %v1017_v40, %v1019_v57 }
 0x2ea   :  { %1027 = vmatprep.subr.mxu1 %v1021_v60 }
 0x2eb   :  { %1028 = vmatpush1.msra.mxu1 %v1020_v62 }
 0x2ec   :  { %v1919_v4 = vpop.permute.xlu1 %1918  ;;  %3590 = vmatmul.mubr.msk.f32.vlgmr.msra.gmra.mrb[4].mxu1 %vm912_vm14, %v4235_v61  ;;  %1111 = vmatprep.subr.mxu1 %v1105_v0  ;;  %v4242_v7 = vpop.permute.xlu0 %1708 }
 0x2ed   :  { %1112 = vmatpush1.msra.mxu1 %v1104_v2  ;;  %1175 = vmatprep.mubr.f32.mxu1 %v3782_v3 }
 0x2f0   :  { %v1361_v8 = vpop.permute.xlu1 %1360  ;;  %v1445_v15 = vpop.permute.xlu0 %1444 }
 0x2f1   :  { %v1363_v16 = vsel %vm415_vm5, %v1359_v43, %v1361_v8  ;;  %v1449_v25 = vsel %vm509_vm8, %v1445_v15, %v1447_v28  ;;  %v1448_v39 = vsel %vm509_vm8, %v1443_v46, %v1445_v15  ;;  %v4274_v28 = vld [vmem:[%s4558_s3 + $0x30] sm:$0xff]  ;;  %v1834_v46 = vsel %vm47_vm0, %v1829_v33, %v1831_v31  ;;  %v4296_v31 = vld [vmem:[%s4558_s3 + $0x28] sm:$0xff] }
 0x2f2   :  { %1369 = vmatprep.subr.mxu0 %v1363_v16 }
 0x2f3   :  { %1370 = vmatpush1.msra.mxu0 %v1362_v22 }
 0x2f4   :  { %v4257_v23 = vpop.permute.xlu1 %1704  ;;  %3591 = vmatmul.mubr.msk.f32.vlgmr.msra.gmra.mrb[4].mxu1 %vm912_vm14, %v4249_v19  ;;  %v2009_v6 = vpop.permute.xlu0 %2008  ;;  %3597 = vmatmul.mubr.msk.f32.vlgmr.msra.gmra.mrb[6].mxu0 %vm912_vm14, %v4254_v20 }
 0x2f5   :  { %1455 = vmatprep.subr.mxu0 %v1449_v25  ;;  %1267 = vmatprep.mubr.f32.mxu1 %v3782_v3 }
 0x2f6   :  { %1456 = vmatpush1.msra.mxu0 %v1448_v39  ;;  %1519 = vmatprep.mubr.f32.mxu0 %v3782_v3 }
 0x2f7   :  { %3609 = vmatprep.subr.msk.mxu0 %vm54_vm1, %v1835_v24 }
 0x2f8   :  { %v1193_v40 = vpop.permute.xlu1 %1192  ;;  %v1623_v43 = vpop.permute.xlu0 %1622 }
 0x2f9   :  { %v1196_v53 = vsel %vm230_vm4, %v1191_v42, %v1193_v40  ;;  %v1197_v57 = vsel %vm230_vm4, %v1193_v40, %v1195_v5  ;;  %v1921_v42 = vsel %vm136_vm3, %v4227_v37, %v1919_v4  ;;  %v1625_v33 = vsel %vm701_vm7, %v1621_v49, %v1623_v43 }
 0x2fa   :  { %1203 = vmatprep.subr.mxu1 %v1197_v57  ;;  %v1920_v4 = vsel %vm136_vm3, %v4229_v59, %v4227_v37  ;;  %v4318_v37 = vld [vmem:[%s4558_s3 + $0x10] sm:$0xff] }
 0x2fb   :  { %1204 = vmatpush1.msra.mxu1 %v1196_v53 }
 0x2fc   :  { %v1537_v60 = vpop.permute.xlu1 %1536  ;;  %3593 = vmatmul.mubr.msk.f32.vlgmr.msra.gmra.mrb[4].mxu1 %vm912_vm14, %v4274_v28  ;;  %3599 = vmatmul.mubr.msk.f32.vlgmr.msra.gmra.mrb[6].mxu0 %vm912_vm14, %v4279_v32  ;;  %v2007_v5 = vpop.permute.xlu0 %2006 }
 0x2fd   :  { %v1540_v62 = vsel %vm611_vm6, %v1535_v44, %v1537_v60  ;;  %3610 = vmatpush1.msk.msra.mxu0 %vm54_vm1, %v1834_v46  ;;  %v1541_v0 = vsel %vm611_vm6, %v1537_v60, %v4223_v26  ;;  %1611 = vmatprep.mubr.f32.mxu1 %v3782_v3  ;;  %v1624_v44 = vsel %vm701_vm7, %v4225_v35, %v1621_v49 }
 0x2fe   :  { %3612 = vmatprep.subr.msk.mxu0 %vm54_vm1, %v1921_v42  ;;  %1547 = vmatprep.subr.mxu1 %v1541_v0  ;;  %v2012_v15 = vsel %vm230_vm4, %v2007_v5, %v2009_v6 }
 0x2ff   :  { %1548 = vmatpush1.msra.mxu1 %v1540_v62  ;;  %1907 = vmatprep.mubr.f32.mxu0 %v3782_v3 }
 0x300   :  { %v2011_v2 = vpop.permute.xlu1 %2010  ;;  %3602 = vmatmul.mubr.msk.f32.vlgmr.msra.gmra.mrb[6].mxu1 %vm912_vm14, %v4296_v31  ;;  %1631 = vmatprep.subr.mxu1 %v1625_v33  ;;  %v2380_v26 = vpop.permute.xlu0 %2379 }
 0x301   :  { %v2013_v8 = vsel %vm230_vm4, %v2009_v6, %v2011_v2  ;;  %3611 = vmatmul.mubr.msk.f32.vlgmr.msra.gmra.mrb[8].mxu0 %vm50_vm2, %v3909_v21  ;;  %1632 = vmatpush1.msra.mxu1 %v1624_v44 }
 0x302   :  { %3613 = vmatpush1.msk.msra.mxu0 %vm54_vm1, %v1920_v4  ;;  %1695 = vmatprep.mubr.f32.mxu1 %v3782_v3 }
 0x303   :  { %3618 = vmatprep.subr.msk.mxu0 %vm54_vm1, %v2013_v8  ;;  %1993 = vmatprep.mubr.f32.mxu0 %v3782_v3 }
 0x304   :  { %v2378_v35 = vpop.permute.xlu1 %2377  ;;  %v2187_v49 = vpop.permute.xlu0 %2186 }
 0x305   :  { %v2382_v16 = vsel %vm611_vm6, %v2378_v35, %v2380_v26 }
 0x308   :  { %v2376_v59 = vpop.permute.xlu1 %2375  ;;  %3603 = vmatmul.mubr.msk.f32.vlgmr.msra.gmra.mrb[6].mxu1 %vm912_vm14, %v4318_v37  ;;  %v2185_v21 = vpop.permute.xlu0 %2184 }
 0x309   :  { %3614 = vmatmul.mubr.msk.f32.vlgmr.msra.gmra.mrb[8].mxu0 %vm50_vm2, %v3925_v30  ;;  %1781 = vmatprep.mubr.f32.mxu1 %v3782_v3  ;;  %v4337_v30 = vld [vmem:[%s4558_s3 + $0x40] sm:$0xff]  ;;  %v2381_v40 = vsel %vm611_vm6, %v2376_v59, %v2378_v35  ;;  %s3798_s3 = smov [#allocation3]  }
 0x30a   :  { %3619 = vmatpush1.msk.msra.mxu0 %vm54_vm1, %v2012_v15  ;;  %2085 = vmatprep.mubr.f32.mxu0 %v3782_v3 }
 0x30b   :  { %3644 = vmatprep.subr.msk.mxu0 %vm54_vm1, %v2382_v16 }
 0x30c   :  { %v1707_v22 = vpop.permute.xlu1 %1706  ;;  %v2469_v25 = vpop.permute.xlu0 %2468 }
 0x30d   :  { %v1710_v39 = vsel %vm795_vm9, %v4257_v23, %v1707_v22  ;;  %v1711_v6 = vsel %vm795_vm9, %v1707_v22, %v4242_v7 }
 0x30e   :  { %1717 = vmatprep.subr.mxu1 %v1711_v6 }
 0x30f   :  { %1718 = vmatpush1.msra.mxu1 %v1710_v39 }
 0x310   :  { %v2189_v24 = vpop.permute.xlu1 %2188  ;;  %3605 = vmatmul.mubr.msk.f32.vlgmr.msra.gmra.mrb[6].mxu1 %vm912_vm14, %v4337_v30  ;;  %3626 = vmatprep.subr.msk.mxu1 %vm54_vm1, %v4161_v13  ;;  %v2279_v7 = vpop.permute.xlu0 %2278  ;;  %v2190_v13 = vsel %vm415_vm5, %v2185_v21, %v2187_v49 }
 0x311   :  { %v2191_v23 = vsel %vm415_vm5, %v2187_v49, %v2189_v24  ;;  %3620 = vmatmul.mubr.msk.f32.vlgmr.msra.gmra.mrb[8].mxu0 %vm50_vm2, %v3938_v36  ;;  %3627 = vmatpush1.msk.msra.mxu1 %vm54_vm1, %v4153_v12 }
 0x312   :  { %3645 = vmatpush1.msk.msra.mxu0 %vm54_vm1, %v2381_v40  ;;  %3629 = vmatprep.subr.msk.mxu1 %vm54_vm1, %v2191_v23 }
 0x313   :  { %2174 = vmatprep.mubr.f32.mxu1 %v3782_v3  ;;  %2454 = vmatprep.mubr.f32.mxu0 %v3782_v3 }
 0x314   :  { %v2467_v43 = vpop.permute.xlu1 %2466  ;;  %3628 = vmatmul.mubr.msk.f32.vlgmr.msra.gmra.mrb[8].mxu1 %vm50_vm2, %v3950_v41  ;;  %v2277_v53 = vpop.permute.xlu0 %2276 }
 0x315   :  { %v2471_v36 = vsel %vm701_vm7, %v2467_v43, %v2469_v25  ;;  %3630 = vmatpush1.msk.msra.mxu1 %vm54_vm1, %v2190_v13  ;;  %3646 = vmatmul.mubr.msk.f32.vlgmr.msra.gmra.mrb[10].mxu0 %vm50_vm2, %v3968_v47  ;;  %v2282_v47 = vsel %vm509_vm8, %v2277_v53, %v2279_v7 }
 0x316   :  { %3647 = vmatprep.subr.msk.mxu0 %vm54_vm1, %v2471_v36  ;;  %2263 = vmatprep.mubr.f32.mxu1 %v3782_v3 }
 0x317   :  { %2543 = vmatprep.mubr.f32.mxu0 %v3782_v3 }
 0x318   :  { %v2465_v12 = vpop.permute.xlu1 %2464  ;;  %v2561_v60 = vpop.permute.xlu0 %2560 }
 0x319   :  { %v2470_v57 = vsel %vm701_vm7, %v2465_v12, %v2467_v43 }
 0x31a   :  { %3648 = vmatpush1.msk.msra.mxu0 %vm54_vm1, %v2470_v57 }
 0x31c   :  { %v2281_v41 = vpop.permute.xlu1 %2280  ;;  %3631 = vmatmul.mubr.msk.f32.vlgmr.msra.gmra.mrb[8].mxu1 %vm50_vm2, %v3960_v45 }
 0x31d   :  { %v2283_v46 = vsel %vm509_vm8, %v2279_v7, %v2281_v41  ;;  %3649 = vmatmul.mubr.msk.f32.vlgmr.msra.gmra.mrb[10].mxu0 %vm50_vm2, %v3985_v55  ;;  %2355 = vmatprep.mubr.f32.mxu1 %v3782_v3 }
 0x31e   :  { %3635 = vmatprep.subr.msk.mxu1 %vm54_vm1, %v2283_v46  ;;  %2635 = vmatprep.mubr.f32.mxu0 %v3782_v3 }
 0x31f   :  { %3636 = vmatpush1.msk.msra.mxu1 %vm54_vm1, %v2282_v47 }
 0x320   :  { %v2559_v5 = vpop.permute.xlu1 %2558 }
 0x321   :  { %v2563_v42 = vsel %vm795_vm9, %v2559_v5, %v2561_v60 }
 0x322   :  { %3653 = vmatprep.subr.msk.mxu0 %vm54_vm1, %v2563_v42 }
 0x324   :  { %v2557_v45 = vpop.permute.xlu1 %2556  ;;  %3637 = vmatmul.mubr.msk.f32.vlgmr.msra.gmra.mrb[8].mxu1 %vm50_vm2, %v3993_v58 }
 0x325   :  { %v2562_v55 = vsel %vm795_vm9, %v2557_v45, %v2559_v5  ;;  %2724 = vmatprep.mubr.f32.mxu1 %v3782_v3  ;;  %v3796_v45 = vmov 7  }
 0x326   :  { %3654 = vmatpush1.msk.msra.mxu0 %vm54_vm1, %v2562_v55  ;;  %3749 = vset.pattern.permute.xlu1 %v3796_v45 }
 0x327   :  { %3655 = vmatmul.mubr.msk.f32.vlgmr.msra.gmra.mrb[10].mxu0 %vm50_vm2, %v4005_v63 }
 0x328   :  { %3081 = vmatprep.mubr.f32.mxu0 %v3782_v3 }
 0x3cf   :  { %v1269_v62 = vpop.f32.mrb[4].mxu1  ;;  %v1521_v0 = vpop.f32.mrb[6].mxu0 }
 0x3d0   :  { %v1276_v33 = vsel %vm4043_vm10, %v1269_v62, 0.0  ;;  %v1271_v44 = vpop.f32.mrb[5].mxu1  ;;  %v1523_v2 = vpop.f32.mrb[7].mxu0 }
 0x3d1   :  { %v1528_v26 = vadd.f32 %v1521_v0, %v1276_v33  ;;  %v1277_v58 = vsel %vm4047_vm11, %v1271_v44, 0.0 }
 0x3d2   :  { %v1529_v4 = vadd.f32 %v1523_v2, %v1277_v58 }
 0x3e3   :  { %v1783_v8 = vpop.f32.mrb[6].mxu1 }
 0x3e4   :  { %v1790_v35 = vsel %vm4055_vm12, %v1783_v8, 0.0  ;;  %v2087_v49 = vpop.f32.mrb[8].mxu0  ;;  %v1785_v63 = vpop.f32.mrb[7].mxu1 }
 0x3e5   :  { %v4391_v59 = vadd.f32 %v1790_v35, %v1528_v26  ;;  %v1791_v21 = vsel %vm4059_vm13, %v1785_v63, 0.0  ;;  %v2089_v15 = vpop.f32.mrb[9].mxu0  ;;  %v2094_v22 = vsel %vm4043_vm10, %v2087_v49, 0.0 }
 0x3e6   :  { %v4395_v16 = vadd.f32 %v1791_v21, %v1529_v4  ;;  %v2095_v39 = vsel %vm4047_vm11, %v2089_v15, 0.0 }
 0x3f7   :  { %v2357_v25 = vpop.f32.mrb[8].mxu1 }
 0x3f8   :  { %v2364_v6 = vadd.f32 %v2357_v25, %v2094_v22  ;;  %v2359_v24 = vpop.f32.mrb[9].mxu1 }
 0x3f9   :  { %v2365_v40 = vadd.f32 %v2359_v24, %v2095_v39 }
 0x3fa   :  { %v2637_v23 = vpop.f32.mrb[10].mxu0 }
 0x3fb   :  { %v2644_v7 = vsel %vm4055_vm12, %v2637_v23, 0.0  ;;  %v2639_v13 = vpop.f32.mrb[11].mxu0 }
 0x3fc   :  { %v2646_v43 = vadd.f32 %v2644_v7, %v2364_v6  ;;  %v2645_v36 = vsel %vm4059_vm13, %v2639_v13, 0.0 }
 0x3fd   :  { %v2647_v12 = vadd.f32 %v2645_v36, %v2365_v40 }
 0x3fe   :  { %v2648_v53 = vadd.f32 %v2646_v43, %v4065_v34 }
 0x3ff   :  { %v2649_v57 = vadd.f32 %v2647_v12, %v4065_v34  ;;  %v3795_v34 = vmov 6  }
 0x400   :  { %v2650_v41 = vmax.f32 %v2648_v53, 0.0  ;;  %3748 = vset.pattern.permute.xlu0 %v3795_v34 }
 0x401   :  { %v2651_v46 = vmax.f32 %v2649_v57, 0.0 }
 0x402   :  { %v2652_v47 = vmul.f32 %v2650_v41, %v4069_v38 }
 0x403   :  { %v2653_v60 = vmul.f32 %v2651_v46, %v4069_v38 }
 0x404   :  { %v4413_v42 = vadd.f32 %v2652_v47, %v4074_v48 }
 0x405   :  { %v4410_v5 = vadd.f32 %v2653_v60, %v4074_v48 }
 0x407   :  { %2660 = vmatprep.subr.mxu1 %v4410_v5 }
 0x408   :  { %2661 = vmatpush1.msra.mxu1 %v4413_v42 }
 0x409   :  { %3656 = vmatmul.mubr.msk.f32.vlgmr.msra.gmra.mrb[10].mxu1 %vm912_vm14, %v4086_v52 }
 0x40a   :  { %2826 = vmatprep.mubr.f32.mxu1 %v3782_v3 }
 0x4dc   :  { %v2726_v38 = vpop.f32.mrb[10].mxu1 }
 0x4dd   :  { %v2727_v55 = vadd.f32 %v2726_v38, %v4099_v54  ;;  %v2728_v62 = vpop.f32.mrb[11].mxu1 }
 0x4de   :  { %v2729_v48 = vadd.f32 %v2728_v62, %v4099_v54  ;;  %v3797_v54 = vmov 8  }
 0x4df   :  { %v2731_v0 = vmax.f32 %v2727_v55, 0.0 }
 0x4e0   :  { %v2732_v33 = vmax.f32 %v2729_v48, 0.0 }
 0x4e1   :  { %v2733_v44 = vmul.f32 %v2731_v0, %v4101_v56 }
 0x4e2   :  { %v2734_v2 = vmul.f32 %v2732_v33, %v4101_v56  ;;  %v2750_v56 = vpop.permute.xlu0 %2749 }
 0x4e3   :  { %v2735_v52 = vadd.f32 %v2733_v44, %v4105_v1 }
 0x4e4   :  { %v2736_v26 = vadd.f32 %v2734_v2, %v4105_v1 }
 0x4e5   :  { %v4427_v58 = vadd.f32 %v2735_v52, %v4413_v42 }
 0x4e6   :  { %v4430_v4 = vadd.f32 %v2736_v26, %v4410_v5 }
 0x4e7   :  { %2835 = vrot.lane.b32.xlu1 %v4427_v58, %s3781_s23  ;;  %2751 = vrot.lane.b32.xlu0 %v4427_v58, %s3780_s20 }
 0x4e8   :  { %3017 = vmatprep.subr.mxu0 %v4430_v4 }
 0x4e9   :  { %3018 = vmatpush1.msra.mxu0 %v4427_v58 }
 0x4ea   :  { %3664 = vmatmul.mubr.msk.f32.vlgmr.msra.gmra.mrb[12].mxu0 %vm912_vm14, %v4130_v11 }
 0x4eb   :  { %2753 = vrot.lane.b32.xlu1 %v4430_v4, %s3780_s20  ;;  %2924 = vrot.lane.b32.xlu0 %v4427_v58, %s3783_s28  ;;  %s3542_s20 = sshll.u32 %s3798_s3, 4  ;;  %s3543_s20 = int_to_ptr.vmem [resolvable:$true] %s3542_s20 }
 0x4ec   :  { %3165 = vmatprep.mubr.f32.mxu0 %v3782_v3  ;;  %p3761_p1 = scmp.lt.s32.totalorder %s3543_s20, %s3543_s20 }
 0x4ef   :  { %2833 = vrot.lane.b32.xlu1 %v3782_v3, %s3781_s23  ;;  %3267 = vrot.lane.b32.xlu0 %v3782_v3, %s3784_s29 }
 0x4f3   :  { %2928 = vrot.lane.b32.xlu1 %v3782_v3, %s3783_s28  ;;  %2837 = vrot.lane.b32.xlu0 %v4430_v4, %s3781_s23  ;;  %s3756_s23 = scalar_lea.vmem %s3543_s20, 512 }
 0x4f4   :  { %p3757_p0 = scmp.ne.s32.totalorder %s3543_s20, %s3756_s23  ;;  %p3762_p2 = scmp.lt.s32.totalorder %s3756_s23, %s3756_s23 }
 0x4f6   :  { %p3763_p3 = por %p3762_p2, %p3761_p1 }
 0x4f7   :  { %3263 = vrot.lane.b32.xlu1 %v4427_v58, %s3784_s29  ;;  %3090 = vrot.lane.b32.xlu0 %v4427_v58, %s3785_s9 }
 0x4f8   :  { %p3764_p4 = pnand %p3763_p3, %p3757_p0 }
 0x4fb   :  { %3349 = vrot.lane.b32.xlu1 %v4427_v58, %s3786_s10  ;;  %2926 = vrot.lane.b32.xlu0 %v4430_v4, %s3783_s28 }
 0x4ff   :  { %3265 = vrot.lane.b32.xlu1 %v4430_v4, %s3784_s29  ;;  %3088 = vrot.lane.b32.xlu0 %v3782_v3, %s3785_s9 }
 0x503   :  { %3347 = vrot.lane.b32.xlu1 %v3782_v3, %s3786_s10  ;;  %3173 = vrot.lane.b32.xlu0 %v4427_v58, %s3787_s15 }
 0x507   :  { %3092 = vrot.lane.b32.xlu1 %v4430_v4, %s3785_s9  ;;  %3351 = vrot.lane.b32.xlu0 %v4430_v4, %s3786_s10 }
 0x50b   :  { %3177 = vrot.lane.b32.xlu1 %v3782_v3, %s3787_s15  ;;  %3175 = vrot.lane.b32.xlu0 %v4430_v4, %s3787_s15 }
 0x50f   :  { %3434 = vrot.lane.b32.xlu1 %v4430_v4, %s3790_s16  ;;  %3436 = vrot.lane.b32.xlu0 %v3782_v3, %s3790_s16 }
 0x513   :  { %3432 = vrot.lane.b32.xlu1 %v4427_v58, %s3790_s16  ;;  %1795 = vperm.xlu0 %3748, %v3899_v14  }
 0x517   :  { %1803 = vperm.xlu1 %3749, %v3899_v14   ;;  %3751 = vset.pattern.permute.xlu0 %v3797_v54 }
 0x51b   :  { %3750 = vset.pattern.permute.xlu1 %v3797_v54 }
 0x51c   :  { %1809 = vperm.xlu1 %3750, %v3899_v14  }
 0x559   :  { %v2836_v1 = vpop.permute.xlu1 %2835  ;;  %v2752_v11 = vpop.permute.xlu0 %2751 }
 0x55a   :  { %v2755_v63 = vsel %vm47_vm0, %v2750_v56, %v2752_v11 }
 0x55d   :  { %v2754_v8 = vpop.permute.xlu1 %2753  ;;  %v2925_v35 = vpop.permute.xlu0 %2924 }
 0x55e   :  { %v2756_v49 = vsel %vm47_vm0, %v2752_v11, %v2754_v8 }
 0x55f   :  { %2762 = vmatprep.subr.mxu1 %v2756_v49 }
 0x560   :  { %2763 = vmatpush1.msra.mxu1 %v2755_v63 }
 0x561   :  { %v2834_v21 = vpop.permute.xlu1 %2833  ;;  %3658 = vmatmul.mubr.msk.f32.vlgmr.msra.gmra.mrb[12].mxu1 %vm912_vm14, %v4235_v61  ;;  %v3268_v15 = vpop.permute.xlu0 %3267 }
 0x562   :  { %2910 = vmatprep.mubr.f32.mxu1 %v3782_v3  ;;  %v2839_v39 = vsel %vm136_vm3, %v2834_v21, %v2836_v1 }
 0x565   :  { %v2929_v22 = vpop.permute.xlu1 %2928  ;;  %v2838_v14 = vpop.permute.xlu0 %2837 }
 0x566   :  { %v2840_v25 = vsel %vm136_vm3, %v2836_v1, %v2838_v14 }
 0x567   :  { %2846 = vmatprep.subr.mxu1 %v2840_v25 }
 0x568   :  { %2847 = vmatpush1.msra.mxu1 %v2839_v39 }
 0x569   :  { %v3264_v6 = vpop.permute.xlu1 %3263  ;;  %3659 = vmatmul.mubr.msk.f32.vlgmr.msra.gmra.mrb[12].mxu1 %vm912_vm14, %v4249_v19  ;;  %v3091_v24 = vpop.permute.xlu0 %3090 }
 0x56a   :  { %3001 = vmatprep.mubr.f32.mxu1 %v3782_v3 }
 0x56d   :  { %v3350_v40 = vpop.permute.xlu1 %3349  ;;  %v2927_v61 = vpop.permute.xlu0 %2926 }
 0x56e   :  { %v2930_v23 = vsel %vm230_vm4, %v2925_v35, %v2927_v61  ;;  %v2931_v7 = vsel %vm230_vm4, %v2927_v61, %v2929_v22 }
 0x56f   :  { %2937 = vmatprep.subr.mxu1 %v2931_v7 }
 0x570   :  { %2938 = vmatpush1.msra.mxu1 %v2930_v23 }
 0x571   :  { %v3266_v13 = vpop.permute.xlu1 %3265  ;;  %3661 = vmatmul.mubr.msk.f32.vlgmr.msra.gmra.mrb[12].mxu1 %vm912_vm14, %v4274_v28  ;;  %v3089_v43 = vpop.permute.xlu0 %3088 }
 0x572   :  { %v3269_v36 = vsel %vm611_vm6, %v3264_v6, %v3266_v13  ;;  %v3270_v19 = vsel %vm611_vm6, %v3266_v13, %v3268_v15  ;;  %3340 = vmatprep.mubr.f32.mxu1 %v3782_v3  ;;  %v3094_v47 = vsel %vm415_vm5, %v3089_v43, %v3091_v24 }
 0x573   :  { %3276 = vmatprep.subr.mxu1 %v3270_v19 }
 0x574   :  { %3277 = vmatpush1.msra.mxu1 %v3269_v36 }
 0x575   :  { %v3348_v12 = vpop.permute.xlu1 %3347  ;;  %v3174_v53 = vpop.permute.xlu0 %3173  ;;  %3670 = vmatmul.mubr.msk.f32.vlgmr.msra.gmra.mrb[14].mxu1 %vm912_vm14, %v4296_v31 }
 0x576   :  { %3424 = vmatprep.mubr.f32.mxu1 %v3782_v3  ;;  %v3353_v60 = vsel %vm701_vm7, %v3348_v12, %v3350_v40 }
 0x579   :  { %v3093_v57 = vpop.permute.xlu1 %3092  ;;  %v3352_v41 = vpop.permute.xlu0 %3351 }
 0x57a   :  { %v3095_v28 = vsel %vm415_vm5, %v3091_v24, %v3093_v57  ;;  %v3354_v46 = vsel %vm701_vm7, %v3350_v40, %v3352_v41 }
 0x57b   :  { %3101 = vmatprep.subr.mxu0 %v3095_v28  ;;  %3360 = vmatprep.subr.mxu1 %v3354_v46 }
 0x57c   :  { %3102 = vmatpush1.msra.mxu0 %v3094_v47  ;;  %3361 = vmatpush1.msra.mxu1 %v3353_v60 }
 0x57d   :  { %v3178_v34 = vpop.permute.xlu1 %3177  ;;  %v3176_v45 = vpop.permute.xlu0 %3175  ;;  %3665 = vmatmul.mubr.msk.f32.vlgmr.msra.gmra.mrb[12].mxu0 %vm912_vm14, %v4254_v20  ;;  %3671 = vmatmul.mubr.msk.f32.vlgmr.msra.gmra.mrb[14].mxu1 %vm912_vm14, %v4318_v37 }
 0x57e   :  { %v3179_v31 = vsel %vm509_vm8, %v3174_v53, %v3176_v45  ;;  %v3180_v38 = vsel %vm509_vm8, %v3176_v45, %v3178_v34  ;;  %3250 = vmatprep.mubr.f32.mxu0 %v3782_v3  ;;  %3509 = vmatprep.mubr.f32.mxu1 %v3782_v3 }
 0x57f   :  { %3186 = vmatprep.subr.mxu0 %v3180_v38 }
 0x580   :  { %3187 = vmatpush1.msra.mxu0 %v3179_v31 }
 0x581   :  { %v3435_v55 = vpop.permute.xlu1 %3434  ;;  %v3437_v62 = vpop.permute.xlu0 %3436 }
 0x582   :  { %v3439_v48 = vsel %vm795_vm9, %v3435_v55, %v3437_v62 }
 0x583   :  { %3445 = vmatprep.subr.mxu1 %v3439_v48 }
 0x585   :  { %v3433_v0 = vpop.permute.xlu1 %3432  ;;  %3667 = vmatmul.mubr.msk.f32.vlgmr.msra.gmra.mrb[12].mxu0 %vm912_vm14, %v4279_v32 }
 0x586   :  { %v3438_v20 = vsel %vm795_vm9, %v3433_v0, %v3435_v55 }
 0x587   :  { %3446 = vmatpush1.msra.mxu1 %v3438_v20 }
 0x588   :  { %3673 = vmatmul.mubr.msk.f32.vlgmr.msra.gmra.mrb[14].mxu1 %vm912_vm14, %v4337_v30 }
 0x592   :  { %v1796_v37 = vpop.permute.xlu0 %1795 }
 0x593   :  { %v1798_v3 = vadd.f32 %v1796_v37, %v4391_v59  ;;  %v1799_v33 = vadd.f32 %v1796_v37, %v4395_v16 }
 0x595   :  { %v1800_v44 = vmax.f32 %v1798_v3, 0.0  ;;  %v1801_v2 = vmax.f32 %v1799_v33, 0.0 }
 0x596   :  { %v1804_v52 = vpop.permute.xlu1 %1803 }
 0x597   :  { %v1806_v26 = vmul.f32 %v1804_v52, %v1800_v44  ;;  %v1807_v54 = vmul.f32 %v1804_v52, %v1801_v2 }
 0x59b   :  { %v1810_v56 = vpop.permute.xlu1 %1809 }
 0x59c   :  { %v1812_v1 = vadd.f32 %v1810_v56, %v1806_v26  ;;  %v1813_v11 = vadd.f32 %v1810_v56, %v1807_v54 }
 0x59e   :  { %v1814_v32 = vadd.f32 %v1812_v1, %v4081_v51  ;;  %v1815_v8 = vadd.f32 %v1813_v11, %v4078_v50 }
 0x5a0   :  { %v1816_v35 = vadd.f32 %v1814_v32, %v4112_v9  ;;  %v1817_v30 = vadd.f32 %v1815_v8, %v4115_v10 }
 0x5a2   :  { %1818 = vst [vmem:[#allocation3] sm:$0xff] %v1816_v35  ;;  %1819 = vst [vmem:[#allocation3 + $0x8] sm:$0xff] %v1817_v30 }
 0x644   :  { %v3003_v59 = vpop.f32.mrb[12].mxu1 }
 0x645   :  { %v3005_v16 = vpop.f32.mrb[13].mxu1  ;;  %v3010_v49 = vsel %vm4043_vm10, %v3003_v59, 0.0 }
 0x646   :  { %v3011_v21 = vsel %vm4047_vm11, %v3005_v16, 0.0 }
 0x658   :  { %v3252_v63 = vpop.f32.mrb[12].mxu0 }
 0x659   :  { %v3259_v15 = vadd.f32 %v3252_v63, %v3010_v49  ;;  %v3254_v22 = vpop.f32.mrb[13].mxu0 }
 0x65a   :  { %v3260_v51 = vadd.f32 %v3254_v22, %v3011_v21 }
 0x65b   :  { %v3511_v14 = vpop.f32.mrb[14].mxu1 }
 0x65c   :  { %v3518_v50 = vsel %vm4055_vm12, %v3511_v14, 0.0  ;;  %v3513_v9 = vpop.f32.mrb[15].mxu1 }
 0x65d   :  { %v3520_v10 = vadd.f32 %v3518_v50, %v3259_v15  ;;  %v3519_v25 = vsel %vm4059_vm13, %v3513_v9, 0.0 }
 0x65e   :  { %v3521_v39 = vadd.f32 %v3519_v25, %v3260_v51 }
 0x65f   :  { %v3522_v6 = vadd.f32 %v3520_v10, %v1796_v37 }
 0x660   :  { %v3523_v17 = vadd.f32 %v3521_v39, %v1796_v37 }
 0x661   :  { %v3524_v24 = vmax.f32 %v3522_v6, 0.0 }
 0x662   :  { %v3525_v40 = vmax.f32 %v3523_v17, 0.0 }
 0x663   :  { %v3526_v61 = vmul.f32 %v3524_v24, %v1804_v52 }
 0x664   :  { %v3527_v18 = vmul.f32 %v3525_v40, %v1804_v52 }
 0x665   :  { %v3528_v23 = vadd.f32 %v3526_v61, %v1810_v56 }
 0x666   :  { %v3529_v7 = vadd.f32 %v3527_v18, %v1810_v56 }
 0x667   :  { %v3530_v13 = vadd.f32 %v3528_v23, %v4413_v42 }
 0x668   :  { %v3531_v27 = vadd.f32 %v3529_v7, %v4410_v5 }
 0x669   :  { %v3532_v43 = vadd.f32 %v3530_v13, %v4427_v58 }
 0x66a   :  { %v3533_v29 = vadd.f32 %v3531_v27, %v4430_v4 }
 0x66b   :  { %3535 = vst [vmem:[#allocation3 + $0x10] sm:$0xff] %v3532_v43 }
 0x66c   :  { %3536 = vst [vmem:[#allocation3 + $0x18] sm:$0xff] %v3533_v29 }
 0x66d   :  { %3767 = shalt.err (!%p3764_p4)
}
 0x66e   :  { %s3768_s10 = scalar_lea.hbm %s4560_s5, 512 }
 0x66f   :  { %p3769_p5 = scmp.ne.s32.totalorder %s4560_s5, %s3768_s10  ;;  %p3772_p6 = scmp.lt.u32.totalorder %s3768_s10, %s4560_s5 }
 0x671   :  { %p3774_p7 = pnand %p3772_p6, %p3769_p5 }
 0x673   :  { %3777 = shalt.err (!%p3774_p7)
}
 0x674   :  { %s3799_s21 = smov 256  }
 0x675   :  { %3548 = dma.vmem_to_hbm [thread:$0]  %s3543_s20, 512, %s4560_s5, [#allocation4], %s3799_s21, %s3799_s21, %s3785_s9  }
 0x676   :  { %3778 = dma.done.wait [#allocation4], 512  }
 0x677   :  { %3779 = vsyncadd [#allocation4], 4294966784 }
 0x678   :  { %3552 = vsyncpa [#allocation4], 1 }

</bundles_post_ra>
